<compile_context>
chip_gen: v7x
topology: tpu7x:2x2x1
jax: 0.10.0
libtpu: 0.0.40
codegen_flags: <defaults>
</compile_context>

<pallas_src>
import functools

import jax
import jax.numpy as jnp
from jax import lax
from jax.experimental import pallas as pl
from jax.experimental.pallas import tpu as pltpu


def _make_mha_kernel(batch_tile, seq, num_heads, head_dim, compute_dtype):
    emb = num_heads * head_dim
    scale = float(emb) ** 0.5
    cd = compute_dtype

    def kernel(x_ref, wqkv_ref, bqkv_ref, wproj_ref, bproj_ref, o_ref):
        # x_ref: (batch_tile * seq, emb) rows of the flattened (B*N, E) input.
        x = x_ref[...].astype(cd)
        wqkv = wqkv_ref[...].astype(cd)

        # Fused QKV projection for every row in the tile: a single big MXU matmul.
        qkv = jnp.dot(x, wqkv, preferred_element_type=jnp.float32) + bqkv_ref[...]  # (Mt, 3E) f32

        wp_f32 = wproj_ref[...]                 # (E, E), rows grouped per head (h, d)
        bproj = bproj_ref[...]                  # (1, E) f32

        for b in range(batch_tile):             # small static loop, fully unrolled
            r0 = b * seq
            qkv_b = qkv[r0:r0 + seq, :]         # (N, 3E) static row slice (tile aligned)

            # Per-head scores s_h = q_h @ k_h^T (no pre-softmax scaling, as in the module).
            scores = []
            vals = []
            for h in range(num_heads):
                c0 = h * head_dim
                q_h = qkv_b[:, c0:c0 + head_dim]                          # (N, D)
                k_h = qkv_b[:, emb + c0:emb + c0 + head_dim]              # (N, D)
                v_h = qkv_b[:, 2 * emb + c0:2 * emb + c0 + head_dim]      # (N, D)
                s_h = lax.dot_general(q_h.astype(cd), k_h.astype(cd),
                                      (((1,), (1,)), ((), ())),
                                      preferred_element_type=jnp.float32)  # (N, N) f32
                scores.append(s_h)
                vals.append(v_h)

            # Softmax over the HEAD axis (PyTorch F.softmax(att, dim=1)), then / sqrt(E).
            # Pure elementwise VPU work across the per-head tiles + one approximate (EUP)
            # reciprocal; all softmax math kept in f32.
            m = functools.reduce(jnp.maximum, scores)
            exps = [jnp.exp(s - m) for s in scores]
            denom = functools.reduce(lambda a, b_: a + b_, exps)
            inv = pl.reciprocal(denom * scale, approx=True)               # (N, N) f32

            # Per-head attention-weighted values folded straight into the output projection:
            #   out_b = sum_h (attn_h @ v_h) @ Wproj_t[h*D:(h+1)*D, :]  (+ bias)
            # Everything stays in registers; no VMEM scratch, no masked column stores.
            acc = jnp.zeros((seq, emb), jnp.float32)
            for h in range(num_heads):
                attn_h = exps[h] * inv                                    # (N, N) f32
                o_h = jnp.dot(attn_h.astype(cd), vals[h].astype(cd),
                              preferred_element_type=jnp.float32)         # (N, D) f32
                wp_h = wp_f32[h * head_dim:(h + 1) * head_dim, :].astype(cd)   # (D, E)
                acc = acc + jnp.dot(o_h.astype(cd), wp_h,
                                    preferred_element_type=jnp.float32)   # (N, E) f32

            o_ref[r0:r0 + seq, :] = (acc + bproj).astype(o_ref.dtype)

    return kernel


def mha_forward(x, w_qkv, b_qkv, w_proj, b_proj, *, num_heads=8,
                batch_tile=None, compute_dtype=jnp.float32):
    """x: (B, N, E). Weights use the PyTorch nn.Linear convention:
       w_qkv: (3E, E), b_qkv: (3E,), w_proj: (E, E), b_proj: (E,)."""
    B, N, E = x.shape
    assert E % num_heads == 0
    if batch_tile is None:
        batch_tile = B                       # whole batch in one grid step (v5e/v6e single TC)
    assert B % batch_tile == 0
    mt = batch_tile * N
    assert (mt == B * N) or (mt % 8 == 0), "batch_tile*N must be a multiple of 8"

    x2 = x.reshape(B * N, E)                 # contiguous row flatten: fused-M projections
    w_qkv_t = w_qkv.T                        # (E, 3E): kernel does row-major matmuls
    w_proj_t = w_proj.T                      # (E, E)
    b_qkv2 = b_qkv.reshape(1, 3 * E).astype(jnp.float32)
    b_proj2 = b_proj.reshape(1, E).astype(jnp.float32)

    kernel = _make_mha_kernel(batch_tile, N, num_heads, E // num_heads, compute_dtype)
    out = pl.pallas_call(
        kernel,
        out_shape=jax.ShapeDtypeStruct((B * N, E), x.dtype),
        grid=(B // batch_tile,),
        in_specs=[
            pl.BlockSpec((mt, E), lambda i: (i, 0)),          # batch-tile of rows
            pl.BlockSpec((E, 3 * E), lambda i: (0, 0)),       # fused QKV weight (resident)
            pl.BlockSpec((1, 3 * E), lambda i: (0, 0)),       # QKV bias
            pl.BlockSpec((E, E), lambda i: (0, 0)),           # projection weight
            pl.BlockSpec((1, E), lambda i: (0, 0)),           # projection bias
        ],
        out_specs=pl.BlockSpec((mt, E), lambda i: (i, 0)),
        compiler_params=pltpu.CompilerParams(dimension_semantics=("parallel",)),
    )(x2, w_qkv_t, b_qkv2, w_proj_t, b_proj2)
    return out.reshape(B, N, E)


def reference(x, w_qkv, b_qkv, w_proj, b_proj, num_heads=8):
    """Pure-JAX reproduction of the PyTorch forward (verification only)."""
    B, N, E = x.shape
    D = E // num_heads
    qkv = x @ w_qkv.T + b_qkv                                   # (B, N, 3E)
    qkv = qkv.reshape(B, N, 3, num_heads, D)
    q = jnp.transpose(qkv[:, :, 0], (0, 2, 1, 3))               # (B, H, N, D)
    k = jnp.transpose(qkv[:, :, 1], (0, 2, 1, 3))
    v = jnp.transpose(qkv[:, :, 2], (0, 2, 1, 3))
    att = jnp.einsum('bhqd,bhkd->bhqk', q, k)
    att = jax.nn.softmax(att, axis=1) / (E ** 0.5)              # softmax over HEAD axis
    out = jnp.einsum('bhal,bhlv->bhav', att, v)
    out = jnp.transpose(out, (0, 2, 1, 3)).reshape(B, N, E)
    return out @ w_proj.T + b_proj


if __name__ == "__main__":
    key = jax.random.PRNGKey(0)
    k_x, k_wq, k_bq, k_wp, k_bp = jax.random.split(key, 5)

    B, N, E, H = 2, 8, 64, 8
    x = jax.random.normal(k_x, (B, N, E), dtype=jnp.float32)

    # PyTorch Linear-style uniform(-1/sqrt(fan_in), 1/sqrt(fan_in)) init.
    bound = 1.0 / (E ** 0.5)
    w_qkv = jax.random.uniform(k_wq, (3 * E, E), minval=-bound, maxval=bound, dtype=jnp.float32)
    b_qkv = jax.random.uniform(k_bq, (3 * E,), minval=-bound, maxval=bound, dtype=jnp.float32)
    w_proj = jax.random.uniform(k_wp, (E, E), minval=-bound, maxval=bound, dtype=jnp.float32)
    b_proj = jax.random.uniform(k_bp, (E,), minval=-bound, maxval=bound, dtype=jnp.float32)

    ref = reference(x, w_qkv, b_qkv, w_proj, b_proj, num_heads=H)

    # 1) f32 matmuls, whole batch fused into a single grid step (v5e/v6e-friendly).
    out = jax.block_until_ready(mha_forward(x, w_qkv, b_qkv, w_proj, b_proj, num_heads=H))
    assert out.shape == (B, N, E)
    assert jnp.allclose(out, ref, atol=2e-3, rtol=2e-3), "f32 kernel mismatch vs reference"

    # 2) batch_tile=1: grid of 2 parallel steps (keeps both v7x TensorCores busy).
    out_tiled = jax.block_until_ready(
        mha_forward(x, w_qkv, b_qkv, w_proj, b_proj, num_heads=H, batch_tile=1))
    assert jnp.allclose(out_tiled, ref, atol=2e-3, rtol=2e-3), "tiled kernel mismatch vs reference"

    # 3) bf16 matmul inputs with f32 accumulation (v6e/v7x MXU fast path); softmax math stays f32.
    out_bf16 = jax.block_until_ready(
        mha_forward(x, w_qkv, b_qkv, w_proj, b_proj, num_heads=H, compute_dtype=jnp.bfloat16))
    assert jnp.allclose(out_bf16, ref, atol=5e-2, rtol=5e-2), "bf16 kernel mismatch vs reference"

    print("KERNEL_OK")
</pallas_src>

<mosaic_0001>
module attributes {stable_mosaic.version = 11 : i64} {
  func.func @kernel(%arg0: i32, %arg1: memref<16x64xf32, #tpu.memory_space<vmem>>, %arg2: memref<64x192xf32, #tpu.memory_space<vmem>>, %arg3: memref<1x192xf32, #tpu.memory_space<vmem>>, %arg4: memref<64x64xf32, #tpu.memory_space<vmem>>, %arg5: memref<1x64xf32, #tpu.memory_space<vmem>>, %arg6: memref<16x64xf32, #tpu.memory_space<vmem>>) attributes {dimension_semantics = [#tpu.dimension_semantics<parallel>], iteration_bounds = array<i64: 1>, scalar_prefetch = 0 : i64, scratch_operands = 0 : i64, tpu.core_type = #tpu.core_type<tc>, window_params = [{transform_indices = @transform_0, window_bounds = array<i64: 16, 64>}, {pipeline_mode = #tpu.pipeline_mode<synchronous>, transform_indices = @transform_1, window_bounds = array<i64: 64, 192>}, {pipeline_mode = #tpu.pipeline_mode<synchronous>, transform_indices = @transform_2, window_bounds = array<i64: 1, 192>}, {pipeline_mode = #tpu.pipeline_mode<synchronous>, transform_indices = @transform_3, window_bounds = array<i64: 64, 64>}, {pipeline_mode = #tpu.pipeline_mode<synchronous>, transform_indices = @transform_4, window_bounds = array<i64: 1, 64>}, {transform_indices = @transform_5, window_bounds = array<i64: 16, 64>}]} {
    %c0 = arith.constant 0 : index
    %c0_0 = arith.constant 0 : index
    %0 = vector.load %arg1[%c0, %c0_0] : memref<16x64xf32, #tpu.memory_space<vmem>>, vector<16x64xf32>
    %c0_1 = arith.constant 0 : index
    %c0_2 = arith.constant 0 : index
    %1 = vector.load %arg2[%c0_1, %c0_2] : memref<64x192xf32, #tpu.memory_space<vmem>>, vector<64x192xf32>
    %cst = arith.constant dense<0.000000e+00> : vector<16x192xf32>
    %2 = tpu.matmul %0, %1, %cst {dimension_numbers = #tpu.dot_dimension_numbers<[1], [0], [0], [1], [0, 0, 1, 1], [], []>} : vector<16x64xf32>, vector<64x192xf32>, vector<16x192xf32> -> vector<16x192xf32>
    %c0_3 = arith.constant 0 : index
    %c0_4 = arith.constant 0 : index
    %3 = vector.load %arg3[%c0_3, %c0_4] : memref<1x192xf32, #tpu.memory_space<vmem>>, vector<1x192xf32>
    %4 = vector.broadcast %3 : vector<1x192xf32> to vector<16x192xf32>
    %5 = arith.addf %2, %4 : vector<16x192xf32>
    %c0_5 = arith.constant 0 : index
    %c0_6 = arith.constant 0 : index
    %6 = vector.load %arg4[%c0_5, %c0_6] : memref<64x64xf32, #tpu.memory_space<vmem>>, vector<64x64xf32>
    %c0_7 = arith.constant 0 : index
    %c0_8 = arith.constant 0 : index
    %7 = vector.load %arg5[%c0_7, %c0_8] : memref<1x64xf32, #tpu.memory_space<vmem>>, vector<1x64xf32>
    %8 = vector.extract_strided_slice %5 {offsets = [0, 0], sizes = [8, 192], strides = [1, 1]} : vector<16x192xf32> to vector<8x192xf32>
    %9 = vector.extract_strided_slice %8 {offsets = [0, 0], sizes = [8, 8], strides = [1, 1]} : vector<8x192xf32> to vector<8x8xf32>
    %10 = vector.extract_strided_slice %8 {offsets = [0, 64], sizes = [8, 8], strides = [1, 1]} : vector<8x192xf32> to vector<8x8xf32>
    %11 = vector.extract_strided_slice %8 {offsets = [0, 128], sizes = [8, 8], strides = [1, 1]} : vector<8x192xf32> to vector<8x8xf32>
    %cst_9 = arith.constant dense<0.000000e+00> : vector<8x8xf32>
    %12 = tpu.matmul %9, %10, %cst_9 {dimension_numbers = #tpu.dot_dimension_numbers<[1], [1], [0], [0], [0, 0, 1, 0], [], []>} : vector<8x8xf32>, vector<8x8xf32>, vector<8x8xf32> -> vector<8x8xf32>
    %13 = vector.extract_strided_slice %8 {offsets = [0, 8], sizes = [8, 8], strides = [1, 1]} : vector<8x192xf32> to vector<8x8xf32>
    %14 = vector.extract_strided_slice %8 {offsets = [0, 72], sizes = [8, 8], strides = [1, 1]} : vector<8x192xf32> to vector<8x8xf32>
    %15 = vector.extract_strided_slice %8 {offsets = [0, 136], sizes = [8, 8], strides = [1, 1]} : vector<8x192xf32> to vector<8x8xf32>
    %cst_10 = arith.constant dense<0.000000e+00> : vector<8x8xf32>
    %16 = tpu.matmul %13, %14, %cst_10 {dimension_numbers = #tpu.dot_dimension_numbers<[1], [1], [0], [0], [0, 0, 1, 0], [], []>} : vector<8x8xf32>, vector<8x8xf32>, vector<8x8xf32> -> vector<8x8xf32>
    %17 = vector.extract_strided_slice %8 {offsets = [0, 16], sizes = [8, 8], strides = [1, 1]} : vector<8x192xf32> to vector<8x8xf32>
    %18 = vector.extract_strided_slice %8 {offsets = [0, 80], sizes = [8, 8], strides = [1, 1]} : vector<8x192xf32> to vector<8x8xf32>
    %19 = vector.extract_strided_slice %8 {offsets = [0, 144], sizes = [8, 8], strides = [1, 1]} : vector<8x192xf32> to vector<8x8xf32>
    %cst_11 = arith.constant dense<0.000000e+00> : vector<8x8xf32>
    %20 = tpu.matmul %17, %18, %cst_11 {dimension_numbers = #tpu.dot_dimension_numbers<[1], [1], [0], [0], [0, 0, 1, 0], [], []>} : vector<8x8xf32>, vector<8x8xf32>, vector<8x8xf32> -> vector<8x8xf32>
    %21 = vector.extract_strided_slice %8 {offsets = [0, 24], sizes = [8, 8], strides = [1, 1]} : vector<8x192xf32> to vector<8x8xf32>
    %22 = vector.extract_strided_slice %8 {offsets = [0, 88], sizes = [8, 8], strides = [1, 1]} : vector<8x192xf32> to vector<8x8xf32>
    %23 = vector.extract_strided_slice %8 {offsets = [0, 152], sizes = [8, 8], strides = [1, 1]} : vector<8x192xf32> to vector<8x8xf32>
    %cst_12 = arith.constant dense<0.000000e+00> : vector<8x8xf32>
    %24 = tpu.matmul %21, %22, %cst_12 {dimension_numbers = #tpu.dot_dimension_numbers<[1], [1], [0], [0], [0, 0, 1, 0], [], []>} : vector<8x8xf32>, vector<8x8xf32>, vector<8x8xf32> -> vector<8x8xf32>
    %25 = vector.extract_strided_slice %8 {offsets = [0, 32], sizes = [8, 8], strides = [1, 1]} : vector<8x192xf32> to vector<8x8xf32>
    %26 = vector.extract_strided_slice %8 {offsets = [0, 96], sizes = [8, 8], strides = [1, 1]} : vector<8x192xf32> to vector<8x8xf32>
    %27 = vector.extract_strided_slice %8 {offsets = [0, 160], sizes = [8, 8], strides = [1, 1]} : vector<8x192xf32> to vector<8x8xf32>
    %cst_13 = arith.constant dense<0.000000e+00> : vector<8x8xf32>
    %28 = tpu.matmul %25, %26, %cst_13 {dimension_numbers = #tpu.dot_dimension_numbers<[1], [1], [0], [0], [0, 0, 1, 0], [], []>} : vector<8x8xf32>, vector<8x8xf32>, vector<8x8xf32> -> vector<8x8xf32>
    %29 = vector.extract_strided_slice %8 {offsets = [0, 40], sizes = [8, 8], strides = [1, 1]} : vector<8x192xf32> to vector<8x8xf32>
    %30 = vector.extract_strided_slice %8 {offsets = [0, 104], sizes = [8, 8], strides = [1, 1]} : vector<8x192xf32> to vector<8x8xf32>
    %31 = vector.extract_strided_slice %8 {offsets = [0, 168], sizes = [8, 8], strides = [1, 1]} : vector<8x192xf32> to vector<8x8xf32>
    %cst_14 = arith.constant dense<0.000000e+00> : vector<8x8xf32>
    %32 = tpu.matmul %29, %30, %cst_14 {dimension_numbers = #tpu.dot_dimension_numbers<[1], [1], [0], [0], [0, 0, 1, 0], [], []>} : vector<8x8xf32>, vector<8x8xf32>, vector<8x8xf32> -> vector<8x8xf32>
    %33 = vector.extract_strided_slice %8 {offsets = [0, 48], sizes = [8, 8], strides = [1, 1]} : vector<8x192xf32> to vector<8x8xf32>
    %34 = vector.extract_strided_slice %8 {offsets = [0, 112], sizes = [8, 8], strides = [1, 1]} : vector<8x192xf32> to vector<8x8xf32>
    %35 = vector.extract_strided_slice %8 {offsets = [0, 176], sizes = [8, 8], strides = [1, 1]} : vector<8x192xf32> to vector<8x8xf32>
    %cst_15 = arith.constant dense<0.000000e+00> : vector<8x8xf32>
    %36 = tpu.matmul %33, %34, %cst_15 {dimension_numbers = #tpu.dot_dimension_numbers<[1], [1], [0], [0], [0, 0, 1, 0], [], []>} : vector<8x8xf32>, vector<8x8xf32>, vector<8x8xf32> -> vector<8x8xf32>
    %37 = vector.extract_strided_slice %8 {offsets = [0, 56], sizes = [8, 8], strides = [1, 1]} : vector<8x192xf32> to vector<8x8xf32>
    %38 = vector.extract_strided_slice %8 {offsets = [0, 120], sizes = [8, 8], strides = [1, 1]} : vector<8x192xf32> to vector<8x8xf32>
    %39 = vector.extract_strided_slice %8 {offsets = [0, 184], sizes = [8, 8], strides = [1, 1]} : vector<8x192xf32> to vector<8x8xf32>
    %cst_16 = arith.constant dense<0.000000e+00> : vector<8x8xf32>
    %40 = tpu.matmul %37, %38, %cst_16 {dimension_numbers = #tpu.dot_dimension_numbers<[1], [1], [0], [0], [0, 0, 1, 0], [], []>} : vector<8x8xf32>, vector<8x8xf32>, vector<8x8xf32> -> vector<8x8xf32>
    %41 = arith.maximumf %12, %16 : vector<8x8xf32>
    %42 = arith.maximumf %41, %20 : vector<8x8xf32>
    %43 = arith.maximumf %42, %24 : vector<8x8xf32>
    %44 = arith.maximumf %43, %28 : vector<8x8xf32>
    %45 = arith.maximumf %44, %32 : vector<8x8xf32>
    %46 = arith.maximumf %45, %36 : vector<8x8xf32>
    %47 = arith.maximumf %46, %40 : vector<8x8xf32>
    %48 = arith.subf %12, %47 : vector<8x8xf32>
    %49 = math.exp %48 : vector<8x8xf32>
    %50 = arith.subf %16, %47 : vector<8x8xf32>
    %51 = math.exp %50 : vector<8x8xf32>
    %52 = arith.subf %20, %47 : vector<8x8xf32>
    %53 = math.exp %52 : vector<8x8xf32>
    %54 = arith.subf %24, %47 : vector<8x8xf32>
    %55 = math.exp %54 : vector<8x8xf32>
    %56 = arith.subf %28, %47 : vector<8x8xf32>
    %57 = math.exp %56 : vector<8x8xf32>
    %58 = arith.subf %32, %47 : vector<8x8xf32>
    %59 = math.exp %58 : vector<8x8xf32>
    %60 = arith.subf %36, %47 : vector<8x8xf32>
    %61 = math.exp %60 : vector<8x8xf32>
    %62 = arith.subf %40, %47 : vector<8x8xf32>
    %63 = math.exp %62 : vector<8x8xf32>
    %64 = arith.addf %49, %51 : vector<8x8xf32>
    %65 = arith.addf %64, %53 : vector<8x8xf32>
    %66 = arith.addf %65, %55 : vector<8x8xf32>
    %67 = arith.addf %66, %57 : vector<8x8xf32>
    %68 = arith.addf %67, %59 : vector<8x8xf32>
    %69 = arith.addf %68, %61 : vector<8x8xf32>
    %70 = arith.addf %69, %63 : vector<8x8xf32>
    %cst_17 = arith.constant 8.000000e+00 : f32
    %71 = vector.broadcast %cst_17 : f32 to vector<8x8xf32>
    %72 = arith.mulf %70, %71 : vector<8x8xf32>
    %73 = tpu.reciprocal %72 {approx = true} : vector<8x8xf32> -> vector<8x8xf32>
    %cst_18 = arith.constant 0.000000e+00 : f32
    %74 = vector.broadcast %cst_18 : f32 to vector<8x64xf32>
    %75 = arith.mulf %49, %73 : vector<8x8xf32>
    %cst_19 = arith.constant dense<0.000000e+00> : vector<8x8xf32>
    %76 = tpu.matmul %75, %11, %cst_19 {dimension_numbers = #tpu.dot_dimension_numbers<[1], [0], [0], [1], [0, 0, 1, 1], [], []>} : vector<8x8xf32>, vector<8x8xf32>, vector<8x8xf32> -> vector<8x8xf32>
    %77 = vector.extract_strided_slice %6 {offsets = [0, 0], sizes = [8, 64], strides = [1, 1]} : vector<64x64xf32> to vector<8x64xf32>
    %cst_20 = arith.constant dense<0.000000e+00> : vector<8x64xf32>
    %78 = tpu.matmul %76, %77, %cst_20 {dimension_numbers = #tpu.dot_dimension_numbers<[1], [0], [0], [1], [0, 0, 1, 1], [], []>} : vector<8x8xf32>, vector<8x64xf32>, vector<8x64xf32> -> vector<8x64xf32>
    %79 = arith.addf %74, %78 : vector<8x64xf32>
    %80 = arith.mulf %51, %73 : vector<8x8xf32>
    %cst_21 = arith.constant dense<0.000000e+00> : vector<8x8xf32>
    %81 = tpu.matmul %80, %15, %cst_21 {dimension_numbers = #tpu.dot_dimension_numbers<[1], [0], [0], [1], [0, 0, 1, 1], [], []>} : vector<8x8xf32>, vector<8x8xf32>, vector<8x8xf32> -> vector<8x8xf32>
    %82 = vector.extract_strided_slice %6 {offsets = [8, 0], sizes = [8, 64], strides = [1, 1]} : vector<64x64xf32> to vector<8x64xf32>
    %cst_22 = arith.constant dense<0.000000e+00> : vector<8x64xf32>
    %83 = tpu.matmul %81, %82, %cst_22 {dimension_numbers = #tpu.dot_dimension_numbers<[1], [0], [0], [1], [0, 0, 1, 1], [], []>} : vector<8x8xf32>, vector<8x64xf32>, vector<8x64xf32> -> vector<8x64xf32>
    %84 = arith.addf %79, %83 : vector<8x64xf32>
    %85 = arith.mulf %53, %73 : vector<8x8xf32>
    %cst_23 = arith.constant dense<0.000000e+00> : vector<8x8xf32>
    %86 = tpu.matmul %85, %19, %cst_23 {dimension_numbers = #tpu.dot_dimension_numbers<[1], [0], [0], [1], [0, 0, 1, 1], [], []>} : vector<8x8xf32>, vector<8x8xf32>, vector<8x8xf32> -> vector<8x8xf32>
    %87 = vector.extract_strided_slice %6 {offsets = [16, 0], sizes = [8, 64], strides = [1, 1]} : vector<64x64xf32> to vector<8x64xf32>
    %cst_24 = arith.constant dense<0.000000e+00> : vector<8x64xf32>
    %88 = tpu.matmul %86, %87, %cst_24 {dimension_numbers = #tpu.dot_dimension_numbers<[1], [0], [0], [1], [0, 0, 1, 1], [], []>} : vector<8x8xf32>, vector<8x64xf32>, vector<8x64xf32> -> vector<8x64xf32>
    %89 = arith.addf %84, %88 : vector<8x64xf32>
    %90 = arith.mulf %55, %73 : vector<8x8xf32>
    %cst_25 = arith.constant dense<0.000000e+00> : vector<8x8xf32>
    %91 = tpu.matmul %90, %23, %cst_25 {dimension_numbers = #tpu.dot_dimension_numbers<[1], [0], [0], [1], [0, 0, 1, 1], [], []>} : vector<8x8xf32>, vector<8x8xf32>, vector<8x8xf32> -> vector<8x8xf32>
    %92 = vector.extract_strided_slice %6 {offsets = [24, 0], sizes = [8, 64], strides = [1, 1]} : vector<64x64xf32> to vector<8x64xf32>
    %cst_26 = arith.constant dense<0.000000e+00> : vector<8x64xf32>
    %93 = tpu.matmul %91, %92, %cst_26 {dimension_numbers = #tpu.dot_dimension_numbers<[1], [0], [0], [1], [0, 0, 1, 1], [], []>} : vector<8x8xf32>, vector<8x64xf32>, vector<8x64xf32> -> vector<8x64xf32>
    %94 = arith.addf %89, %93 : vector<8x64xf32>
    %95 = arith.mulf %57, %73 : vector<8x8xf32>
    %cst_27 = arith.constant dense<0.000000e+00> : vector<8x8xf32>
    %96 = tpu.matmul %95, %27, %cst_27 {dimension_numbers = #tpu.dot_dimension_numbers<[1], [0], [0], [1], [0, 0, 1, 1], [], []>} : vector<8x8xf32>, vector<8x8xf32>, vector<8x8xf32> -> vector<8x8xf32>
    %97 = vector.extract_strided_slice %6 {offsets = [32, 0], sizes = [8, 64], strides = [1, 1]} : vector<64x64xf32> to vector<8x64xf32>
    %cst_28 = arith.constant dense<0.000000e+00> : vector<8x64xf32>
    %98 = tpu.matmul %96, %97, %cst_28 {dimension_numbers = #tpu.dot_dimension_numbers<[1], [0], [0], [1], [0, 0, 1, 1], [], []>} : vector<8x8xf32>, vector<8x64xf32>, vector<8x64xf32> -> vector<8x64xf32>
    %99 = arith.addf %94, %98 : vector<8x64xf32>
    %100 = arith.mulf %59, %73 : vector<8x8xf32>
    %cst_29 = arith.constant dense<0.000000e+00> : vector<8x8xf32>
    %101 = tpu.matmul %100, %31, %cst_29 {dimension_numbers = #tpu.dot_dimension_numbers<[1], [0], [0], [1], [0, 0, 1, 1], [], []>} : vector<8x8xf32>, vector<8x8xf32>, vector<8x8xf32> -> vector<8x8xf32>
    %102 = vector.extract_strided_slice %6 {offsets = [40, 0], sizes = [8, 64], strides = [1, 1]} : vector<64x64xf32> to vector<8x64xf32>
    %cst_30 = arith.constant dense<0.000000e+00> : vector<8x64xf32>
    %103 = tpu.matmul %101, %102, %cst_30 {dimension_numbers = #tpu.dot_dimension_numbers<[1], [0], [0], [1], [0, 0, 1, 1], [], []>} : vector<8x8xf32>, vector<8x64xf32>, vector<8x64xf32> -> vector<8x64xf32>
    %104 = arith.addf %99, %103 : vector<8x64xf32>
    %105 = arith.mulf %61, %73 : vector<8x8xf32>
    %cst_31 = arith.constant dense<0.000000e+00> : vector<8x8xf32>
    %106 = tpu.matmul %105, %35, %cst_31 {dimension_numbers = #tpu.dot_dimension_numbers<[1], [0], [0], [1], [0, 0, 1, 1], [], []>} : vector<8x8xf32>, vector<8x8xf32>, vector<8x8xf32> -> vector<8x8xf32>
    %107 = vector.extract_strided_slice %6 {offsets = [48, 0], sizes = [8, 64], strides = [1, 1]} : vector<64x64xf32> to vector<8x64xf32>
    %cst_32 = arith.constant dense<0.000000e+00> : vector<8x64xf32>
    %108 = tpu.matmul %106, %107, %cst_32 {dimension_numbers = #tpu.dot_dimension_numbers<[1], [0], [0], [1], [0, 0, 1, 1], [], []>} : vector<8x8xf32>, vector<8x64xf32>, vector<8x64xf32> -> vector<8x64xf32>
    %109 = arith.addf %104, %108 : vector<8x64xf32>
    %110 = arith.mulf %63, %73 : vector<8x8xf32>
    %cst_33 = arith.constant dense<0.000000e+00> : vector<8x8xf32>
    %111 = tpu.matmul %110, %39, %cst_33 {dimension_numbers = #tpu.dot_dimension_numbers<[1], [0], [0], [1], [0, 0, 1, 1], [], []>} : vector<8x8xf32>, vector<8x8xf32>, vector<8x8xf32> -> vector<8x8xf32>
    %112 = vector.extract_strided_slice %6 {offsets = [56, 0], sizes = [8, 64], strides = [1, 1]} : vector<64x64xf32> to vector<8x64xf32>
    %cst_34 = arith.constant dense<0.000000e+00> : vector<8x64xf32>
    %113 = tpu.matmul %111, %112, %cst_34 {dimension_numbers = #tpu.dot_dimension_numbers<[1], [0], [0], [1], [0, 0, 1, 1], [], []>} : vector<8x8xf32>, vector<8x64xf32>, vector<8x64xf32> -> vector<8x64xf32>
    %114 = arith.addf %109, %113 : vector<8x64xf32>
    %115 = vector.broadcast %7 : vector<1x64xf32> to vector<8x64xf32>
    %116 = arith.addf %114, %115 : vector<8x64xf32>
    %c0_35 = arith.constant 0 : index
    %c0_36 = arith.constant 0 : index
    %117 = vector.load %arg6[%c0_35, %c0_36] : memref<16x64xf32, #tpu.memory_space<vmem>>, vector<8x64xf32>
    tpu.vector_store %arg6[%c0_35, %c0_36], %116 {strides = array<i32>} : memref<16x64xf32, #tpu.memory_space<vmem>>, vector<8x64xf32>,
    %118 = vector.extract_strided_slice %5 {offsets = [8, 0], sizes = [8, 192], strides = [1, 1]} : vector<16x192xf32> to vector<8x192xf32>
    %119 = vector.extract_strided_slice %118 {offsets = [0, 0], sizes = [8, 8], strides = [1, 1]} : vector<8x192xf32> to vector<8x8xf32>
    %120 = vector.extract_strided_slice %118 {offsets = [0, 64], sizes = [8, 8], strides = [1, 1]} : vector<8x192xf32> to vector<8x8xf32>
    %121 = vector.extract_strided_slice %118 {offsets = [0, 128], sizes = [8, 8], strides = [1, 1]} : vector<8x192xf32> to vector<8x8xf32>
    %cst_37 = arith.constant dense<0.000000e+00> : vector<8x8xf32>
    %122 = tpu.matmul %119, %120, %cst_37 {dimension_numbers = #tpu.dot_dimension_numbers<[1], [1], [0], [0], [0, 0, 1, 0], [], []>} : vector<8x8xf32>, vector<8x8xf32>, vector<8x8xf32> -> vector<8x8xf32>
    %123 = vector.extract_strided_slice %118 {offsets = [0, 8], sizes = [8, 8], strides = [1, 1]} : vector<8x192xf32> to vector<8x8xf32>
    %124 = vector.extract_strided_slice %118 {offsets = [0, 72], sizes = [8, 8], strides = [1, 1]} : vector<8x192xf32> to vector<8x8xf32>
    %125 = vector.extract_strided_slice %118 {offsets = [0, 136], sizes = [8, 8], strides = [1, 1]} : vector<8x192xf32> to vector<8x8xf32>
    %cst_38 = arith.constant dense<0.000000e+00> : vector<8x8xf32>
    %126 = tpu.matmul %123, %124, %cst_38 {dimension_numbers = #tpu.dot_dimension_numbers<[1], [1], [0], [0], [0, 0, 1, 0], [], []>} : vector<8x8xf32>, vector<8x8xf32>, vector<8x8xf32> -> vector<8x8xf32>
    %127 = vector.extract_strided_slice %118 {offsets = [0, 16], sizes = [8, 8], strides = [1, 1]} : vector<8x192xf32> to vector<8x8xf32>
    %128 = vector.extract_strided_slice %118 {offsets = [0, 80], sizes = [8, 8], strides = [1, 1]} : vector<8x192xf32> to vector<8x8xf32>
    %129 = vector.extract_strided_slice %118 {offsets = [0, 144], sizes = [8, 8], strides = [1, 1]} : vector<8x192xf32> to vector<8x8xf32>
    %cst_39 = arith.constant dense<0.000000e+00> : vector<8x8xf32>
    %130 = tpu.matmul %127, %128, %cst_39 {dimension_numbers = #tpu.dot_dimension_numbers<[1], [1], [0], [0], [0, 0, 1, 0], [], []>} : vector<8x8xf32>, vector<8x8xf32>, vector<8x8xf32> -> vector<8x8xf32>
    %131 = vector.extract_strided_slice %118 {offsets = [0, 24], sizes = [8, 8], strides = [1, 1]} : vector<8x192xf32> to vector<8x8xf32>
    %132 = vector.extract_strided_slice %118 {offsets = [0, 88], sizes = [8, 8], strides = [1, 1]} : vector<8x192xf32> to vector<8x8xf32>
    %133 = vector.extract_strided_slice %118 {offsets = [0, 152], sizes = [8, 8], strides = [1, 1]} : vector<8x192xf32> to vector<8x8xf32>
    %cst_40 = arith.constant dense<0.000000e+00> : vector<8x8xf32>
    %134 = tpu.matmul %131, %132, %cst_40 {dimension_numbers = #tpu.dot_dimension_numbers<[1], [1], [0], [0], [0, 0, 1, 0], [], []>} : vector<8x8xf32>, vector<8x8xf32>, vector<8x8xf32> -> vector<8x8xf32>
    %135 = vector.extract_strided_slice %118 {offsets = [0, 32], sizes = [8, 8], strides = [1, 1]} : vector<8x192xf32> to vector<8x8xf32>
    %136 = vector.extract_strided_slice %118 {offsets = [0, 96], sizes = [8, 8], strides = [1, 1]} : vector<8x192xf32> to vector<8x8xf32>
    %137 = vector.extract_strided_slice %118 {offsets = [0, 160], sizes = [8, 8], strides = [1, 1]} : vector<8x192xf32> to vector<8x8xf32>
    %cst_41 = arith.constant dense<0.000000e+00> : vector<8x8xf32>
    %138 = tpu.matmul %135, %136, %cst_41 {dimension_numbers = #tpu.dot_dimension_numbers<[1], [1], [0], [0], [0, 0, 1, 0], [], []>} : vector<8x8xf32>, vector<8x8xf32>, vector<8x8xf32> -> vector<8x8xf32>
    %139 = vector.extract_strided_slice %118 {offsets = [0, 40], sizes = [8, 8], strides = [1, 1]} : vector<8x192xf32> to vector<8x8xf32>
    %140 = vector.extract_strided_slice %118 {offsets = [0, 104], sizes = [8, 8], strides = [1, 1]} : vector<8x192xf32> to vector<8x8xf32>
    %141 = vector.extract_strided_slice %118 {offsets = [0, 168], sizes = [8, 8], strides = [1, 1]} : vector<8x192xf32> to vector<8x8xf32>
    %cst_42 = arith.constant dense<0.000000e+00> : vector<8x8xf32>
    %142 = tpu.matmul %139, %140, %cst_42 {dimension_numbers = #tpu.dot_dimension_numbers<[1], [1], [0], [0], [0, 0, 1, 0], [], []>} : vector<8x8xf32>, vector<8x8xf32>, vector<8x8xf32> -> vector<8x8xf32>
    %143 = vector.extract_strided_slice %118 {offsets = [0, 48], sizes = [8, 8], strides = [1, 1]} : vector<8x192xf32> to vector<8x8xf32>
    %144 = vector.extract_strided_slice %118 {offsets = [0, 112], sizes = [8, 8], strides = [1, 1]} : vector<8x192xf32> to vector<8x8xf32>
    %145 = vector.extract_strided_slice %118 {offsets = [0, 176], sizes = [8, 8], strides = [1, 1]} : vector<8x192xf32> to vector<8x8xf32>
    %cst_43 = arith.constant dense<0.000000e+00> : vector<8x8xf32>
    %146 = tpu.matmul %143, %144, %cst_43 {dimension_numbers = #tpu.dot_dimension_numbers<[1], [1], [0], [0], [0, 0, 1, 0], [], []>} : vector<8x8xf32>, vector<8x8xf32>, vector<8x8xf32> -> vector<8x8xf32>
    %147 = vector.extract_strided_slice %118 {offsets = [0, 56], sizes = [8, 8], strides = [1, 1]} : vector<8x192xf32> to vector<8x8xf32>
    %148 = vector.extract_strided_slice %118 {offsets = [0, 120], sizes = [8, 8], strides = [1, 1]} : vector<8x192xf32> to vector<8x8xf32>
    %149 = vector.extract_strided_slice %118 {offsets = [0, 184], sizes = [8, 8], strides = [1, 1]} : vector<8x192xf32> to vector<8x8xf32>
    %cst_44 = arith.constant dense<0.000000e+00> : vector<8x8xf32>
    %150 = tpu.matmul %147, %148, %cst_44 {dimension_numbers = #tpu.dot_dimension_numbers<[1], [1], [0], [0], [0, 0, 1, 0], [], []>} : vector<8x8xf32>, vector<8x8xf32>, vector<8x8xf32> -> vector<8x8xf32>
    %151 = arith.maximumf %122, %126 : vector<8x8xf32>
    %152 = arith.maximumf %151, %130 : vector<8x8xf32>
    %153 = arith.maximumf %152, %134 : vector<8x8xf32>
    %154 = arith.maximumf %153, %138 : vector<8x8xf32>
    %155 = arith.maximumf %154, %142 : vector<8x8xf32>
    %156 = arith.maximumf %155, %146 : vector<8x8xf32>
    %157 = arith.maximumf %156, %150 : vector<8x8xf32>
    %158 = arith.subf %122, %157 : vector<8x8xf32>
    %159 = math.exp %158 : vector<8x8xf32>
    %160 = arith.subf %126, %157 : vector<8x8xf32>
    %161 = math.exp %160 : vector<8x8xf32>
    %162 = arith.subf %130, %157 : vector<8x8xf32>
    %163 = math.exp %162 : vector<8x8xf32>
    %164 = arith.subf %134, %157 : vector<8x8xf32>
    %165 = math.exp %164 : vector<8x8xf32>
    %166 = arith.subf %138, %157 : vector<8x8xf32>
    %167 = math.exp %166 : vector<8x8xf32>
    %168 = arith.subf %142, %157 : vector<8x8xf32>
    %169 = math.exp %168 : vector<8x8xf32>
    %170 = arith.subf %146, %157 : vector<8x8xf32>
    %171 = math.exp %170 : vector<8x8xf32>
    %172 = arith.subf %150, %157 : vector<8x8xf32>
    %173 = math.exp %172 : vector<8x8xf32>
    %174 = arith.addf %159, %161 : vector<8x8xf32>
    %175 = arith.addf %174, %163 : vector<8x8xf32>
    %176 = arith.addf %175, %165 : vector<8x8xf32>
    %177 = arith.addf %176, %167 : vector<8x8xf32>
    %178 = arith.addf %177, %169 : vector<8x8xf32>
    %179 = arith.addf %178, %171 : vector<8x8xf32>
    %180 = arith.addf %179, %173 : vector<8x8xf32>
    %cst_45 = arith.constant 8.000000e+00 : f32
    %181 = vector.broadcast %cst_45 : f32 to vector<8x8xf32>
    %182 = arith.mulf %180, %181 : vector<8x8xf32>
    %183 = tpu.reciprocal %182 {approx = true} : vector<8x8xf32> -> vector<8x8xf32>
    %cst_46 = arith.constant 0.000000e+00 : f32
    %184 = vector.broadcast %cst_46 : f32 to vector<8x64xf32>
    %185 = arith.mulf %159, %183 : vector<8x8xf32>
    %cst_47 = arith.constant dense<0.000000e+00> : vector<8x8xf32>
    %186 = tpu.matmul %185, %121, %cst_47 {dimension_numbers = #tpu.dot_dimension_numbers<[1], [0], [0], [1], [0, 0, 1, 1], [], []>} : vector<8x8xf32>, vector<8x8xf32>, vector<8x8xf32> -> vector<8x8xf32>
    %187 = vector.extract_strided_slice %6 {offsets = [0, 0], sizes = [8, 64], strides = [1, 1]} : vector<64x64xf32> to vector<8x64xf32>
    %cst_48 = arith.constant dense<0.000000e+00> : vector<8x64xf32>
    %188 = tpu.matmul %186, %187, %cst_48 {dimension_numbers = #tpu.dot_dimension_numbers<[1], [0], [0], [1], [0, 0, 1, 1], [], []>} : vector<8x8xf32>, vector<8x64xf32>, vector<8x64xf32> -> vector<8x64xf32>
    %189 = arith.addf %184, %188 : vector<8x64xf32>
    %190 = arith.mulf %161, %183 : vector<8x8xf32>
    %cst_49 = arith.constant dense<0.000000e+00> : vector<8x8xf32>
    %191 = tpu.matmul %190, %125, %cst_49 {dimension_numbers = #tpu.dot_dimension_numbers<[1], [0], [0], [1], [0, 0, 1, 1], [], []>} : vector<8x8xf32>, vector<8x8xf32>, vector<8x8xf32> -> vector<8x8xf32>
    %192 = vector.extract_strided_slice %6 {offsets = [8, 0], sizes = [8, 64], strides = [1, 1]} : vector<64x64xf32> to vector<8x64xf32>
    %cst_50 = arith.constant dense<0.000000e+00> : vector<8x64xf32>
    %193 = tpu.matmul %191, %192, %cst_50 {dimension_numbers = #tpu.dot_dimension_numbers<[1], [0], [0], [1], [0, 0, 1, 1], [], []>} : vector<8x8xf32>, vector<8x64xf32>, vector<8x64xf32> -> vector<8x64xf32>
    %194 = arith.addf %189, %193 : vector<8x64xf32>
    %195 = arith.mulf %163, %183 : vector<8x8xf32>
    %cst_51 = arith.constant dense<0.000000e+00> : vector<8x8xf32>
    %196 = tpu.matmul %195, %129, %cst_51 {dimension_numbers = #tpu.dot_dimension_numbers<[1], [0], [0], [1], [0, 0, 1, 1], [], []>} : vector<8x8xf32>, vector<8x8xf32>, vector<8x8xf32> -> vector<8x8xf32>
    %197 = vector.extract_strided_slice %6 {offsets = [16, 0], sizes = [8, 64], strides = [1, 1]} : vector<64x64xf32> to vector<8x64xf32>
    %cst_52 = arith.constant dense<0.000000e+00> : vector<8x64xf32>
    %198 = tpu.matmul %196, %197, %cst_52 {dimension_numbers = #tpu.dot_dimension_numbers<[1], [0], [0], [1], [0, 0, 1, 1], [], []>} : vector<8x8xf32>, vector<8x64xf32>, vector<8x64xf32> -> vector<8x64xf32>
    %199 = arith.addf %194, %198 : vector<8x64xf32>
    %200 = arith.mulf %165, %183 : vector<8x8xf32>
    %cst_53 = arith.constant dense<0.000000e+00> : vector<8x8xf32>
    %201 = tpu.matmul %200, %133, %cst_53 {dimension_numbers = #tpu.dot_dimension_numbers<[1], [0], [0], [1], [0, 0, 1, 1], [], []>} : vector<8x8xf32>, vector<8x8xf32>, vector<8x8xf32> -> vector<8x8xf32>
    %202 = vector.extract_strided_slice %6 {offsets = [24, 0], sizes = [8, 64], strides = [1, 1]} : vector<64x64xf32> to vector<8x64xf32>
    %cst_54 = arith.constant dense<0.000000e+00> : vector<8x64xf32>
    %203 = tpu.matmul %201, %202, %cst_54 {dimension_numbers = #tpu.dot_dimension_numbers<[1], [0], [0], [1], [0, 0, 1, 1], [], []>} : vector<8x8xf32>, vector<8x64xf32>, vector<8x64xf32> -> vector<8x64xf32>
    %204 = arith.addf %199, %203 : vector<8x64xf32>
    %205 = arith.mulf %167, %183 : vector<8x8xf32>
    %cst_55 = arith.constant dense<0.000000e+00> : vector<8x8xf32>
    %206 = tpu.matmul %205, %137, %cst_55 {dimension_numbers = #tpu.dot_dimension_numbers<[1], [0], [0], [1], [0, 0, 1, 1], [], []>} : vector<8x8xf32>, vector<8x8xf32>, vector<8x8xf32> -> vector<8x8xf32>
    %207 = vector.extract_strided_slice %6 {offsets = [32, 0], sizes = [8, 64], strides = [1, 1]} : vector<64x64xf32> to vector<8x64xf32>
    %cst_56 = arith.constant dense<0.000000e+00> : vector<8x64xf32>
    %208 = tpu.matmul %206, %207, %cst_56 {dimension_numbers = #tpu.dot_dimension_numbers<[1], [0], [0], [1], [0, 0, 1, 1], [], []>} : vector<8x8xf32>, vector<8x64xf32>, vector<8x64xf32> -> vector<8x64xf32>
    %209 = arith.addf %204, %208 : vector<8x64xf32>
    %210 = arith.mulf %169, %183 : vector<8x8xf32>
    %cst_57 = arith.constant dense<0.000000e+00> : vector<8x8xf32>
    %211 = tpu.matmul %210, %141, %cst_57 {dimension_numbers = #tpu.dot_dimension_numbers<[1], [0], [0], [1], [0, 0, 1, 1], [], []>} : vector<8x8xf32>, vector<8x8xf32>, vector<8x8xf32> -> vector<8x8xf32>
    %212 = vector.extract_strided_slice %6 {offsets = [40, 0], sizes = [8, 64], strides = [1, 1]} : vector<64x64xf32> to vector<8x64xf32>
    %cst_58 = arith.constant dense<0.000000e+00> : vector<8x64xf32>
    %213 = tpu.matmul %211, %212, %cst_58 {dimension_numbers = #tpu.dot_dimension_numbers<[1], [0], [0], [1], [0, 0, 1, 1], [], []>} : vector<8x8xf32>, vector<8x64xf32>, vector<8x64xf32> -> vector<8x64xf32>
    %214 = arith.addf %209, %213 : vector<8x64xf32>
    %215 = arith.mulf %171, %183 : vector<8x8xf32>
    %cst_59 = arith.constant dense<0.000000e+00> : vector<8x8xf32>
    %216 = tpu.matmul %215, %145, %cst_59 {dimension_numbers = #tpu.dot_dimension_numbers<[1], [0], [0], [1], [0, 0, 1, 1], [], []>} : vector<8x8xf32>, vector<8x8xf32>, vector<8x8xf32> -> vector<8x8xf32>
    %217 = vector.extract_strided_slice %6 {offsets = [48, 0], sizes = [8, 64], strides = [1, 1]} : vector<64x64xf32> to vector<8x64xf32>
    %cst_60 = arith.constant dense<0.000000e+00> : vector<8x64xf32>
    %218 = tpu.matmul %216, %217, %cst_60 {dimension_numbers = #tpu.dot_dimension_numbers<[1], [0], [0], [1], [0, 0, 1, 1], [], []>} : vector<8x8xf32>, vector<8x64xf32>, vector<8x64xf32> -> vector<8x64xf32>
    %219 = arith.addf %214, %218 : vector<8x64xf32>
    %220 = arith.mulf %173, %183 : vector<8x8xf32>
    %cst_61 = arith.constant dense<0.000000e+00> : vector<8x8xf32>
    %221 = tpu.matmul %220, %149, %cst_61 {dimension_numbers = #tpu.dot_dimension_numbers<[1], [0], [0], [1], [0, 0, 1, 1], [], []>} : vector<8x8xf32>, vector<8x8xf32>, vector<8x8xf32> -> vector<8x8xf32>
    %222 = vector.extract_strided_slice %6 {offsets = [56, 0], sizes = [8, 64], strides = [1, 1]} : vector<64x64xf32> to vector<8x64xf32>
    %cst_62 = arith.constant dense<0.000000e+00> : vector<8x64xf32>
    %223 = tpu.matmul %221, %222, %cst_62 {dimension_numbers = #tpu.dot_dimension_numbers<[1], [0], [0], [1], [0, 0, 1, 1], [], []>} : vector<8x8xf32>, vector<8x64xf32>, vector<8x64xf32> -> vector<8x64xf32>
    %224 = arith.addf %219, %223 : vector<8x64xf32>
    %225 = vector.broadcast %7 : vector<1x64xf32> to vector<8x64xf32>
    %226 = arith.addf %224, %225 : vector<8x64xf32>
    %c8 = arith.constant 8 : index
    %c0_63 = arith.constant 0 : index
    %227 = vector.load %arg6[%c8, %c0_63] : memref<16x64xf32, #tpu.memory_space<vmem>>, vector<8x64xf32>
    tpu.vector_store %arg6[%c8, %c0_63], %226 {strides = array<i32>} : memref<16x64xf32, #tpu.memory_space<vmem>>, vector<8x64xf32>,
    return
  }
  func.func @transform_0(%arg0: i32) -> (i32, i32) {
    %c0_i32 = arith.constant 0 : i32
    %c0_i32_0 = arith.constant 0 : i32
    return %arg0, %c0_i32 : i32, i32
  }
  func.func @transform_1(%arg0: i32) -> (i32, i32) {
    %c0_i32 = arith.constant 0 : i32
    %c0_i32_0 = arith.constant 0 : i32
    %c0_i32_1 = arith.constant 0 : i32
    return %c0_i32, %c0_i32_0 : i32, i32
  }
  func.func @transform_2(%arg0: i32) -> (i32, i32) {
    %c0_i32 = arith.constant 0 : i32
    %c0_i32_0 = arith.constant 0 : i32
    %c0_i32_1 = arith.constant 0 : i32
    return %c0_i32, %c0_i32_0 : i32, i32
  }
  func.func @transform_3(%arg0: i32) -> (i32, i32) {
    %c0_i32 = arith.constant 0 : i32
    %c0_i32_0 = arith.constant 0 : i32
    %c0_i32_1 = arith.constant 0 : i32
    return %c0_i32, %c0_i32_0 : i32, i32
  }
  func.func @transform_4(%arg0: i32) -> (i32, i32) {
    %c0_i32 = arith.constant 0 : i32
    %c0_i32_0 = arith.constant 0 : i32
    %c0_i32_1 = arith.constant 0 : i32
    return %c0_i32, %c0_i32_0 : i32, i32
  }
  func.func @transform_5(%arg0: i32) -> (i32, i32) {
    %c0_i32 = arith.constant 0 : i32
    %c0_i32_0 = arith.constant 0 : i32
    return %arg0, %c0_i32 : i32, i32
  }
}

</mosaic_0001>

<bundles_post_ra>
// kernel: tpu_custom_call.1
= control target key start
LH: loop header
LB: loop body
LE: loop exit
PB: predicated region body
PF: predicated region fallthrough
CT: control target
= control target key end

     0   :  { %10 = vsyncpa [#allocation3], 0  ;;  %s4996_s0 = inlined_call_operand.hbm [shape: f32[16,64], index: 0, kind: input, shape index: {}]   ;;  %s4997_s1 = inlined_call_operand.hbm [shape: f32[64,192], index: 1, kind: input, shape index: {}]   ;;  %s4998_s2 = inlined_call_operand.vmem [shape: f32[1,192], index: 2, kind: input, shape index: {}]   ;;  %s4999_s3 = inlined_call_operand.hbm [shape: f32[64,64], index: 3, kind: input, shape index: {}]   ;;  %s5000_s4 = inlined_call_operand.vmem [shape: f32[1,64], index: 4, kind: input, shape index: {}]   ;;  %s5001_s5 = inlined_call_operand.hbm [shape: f32[16,64], index: 5, kind: output, shape index: {}]  }
   0x1   :  { %11 = vsyncpa [#allocation6], 0 }
   0x2   :  { %12 = vsyncpa [#allocation4], 0  ;;  %s4520_s18 = smov [#allocation5]   ;;  %s4426_s22 = scalar_lea.hbm %s4997_s1, 2048 }
   0x3   :  { %s30_s19 = sshll.u32 %s4520_s18, 4  ;;  %p4427_p0 = scmp.ne.s32.totalorder %s4997_s1, %s4426_s22  ;;  %s31_s19 = int_to_ptr.vmem [resolvable:$true] %s30_s19 }
   0x4   :  { %p4430_p1 = scmp.lt.u32.totalorder %s4426_s22, %s4997_s1 }
   0x6   :  { %p4432_p2 = pnand %p4430_p1, %p4427_p0 }
   0x8   :  { %4435 = shalt.err (!%p4432_p2)
}
   0x9   :  { %s4436_s27 = scalar_lea.vmem %s31_s19, 2048  ;;  %p4441_p4 = scmp.lt.s32.totalorder %s31_s19, %s31_s19 }
   0xa   :  { %p4437_p3 = scmp.ne.s32.totalorder %s31_s19, %s4436_s27  ;;  %p4442_p5 = scmp.lt.s32.totalorder %s4436_s27, %s4436_s27 }
   0xc   :  { %p4443_p6 = por %p4442_p5, %p4441_p4 }
   0xe   :  { %p4444_p7 = pnand %p4443_p6, %p4437_p3 }
  0x10   :  { %4447 = shalt.err (!%p4444_p7)
}
  0x11   :  { %s4521_s28 = smov 256   ;;  %s4522_s29 = smov 16  }
  0x12   :  { %36 = dma.hbm_to_vmem [thread:$0]  %s4997_s1, 2048, %s31_s19, [#allocation6], %s4521_s28, %s4521_s28, %s4522_s29  }
  0x13   :  { %s4523_s7 = smov [#allocation2]   ;;  %s4448_s11 = scalar_lea.hbm %s4996_s0, 256 }
  0x14   :  { %s18_s8 = sshll.u32 %s4523_s7, 4  ;;  %p4449_p8 = scmp.ne.s32.totalorder %s4996_s0, %s4448_s11  ;;  %s19_s8 = int_to_ptr.vmem [resolvable:$true] %s18_s8 }
  0x15   :  { %p4452_p9 = scmp.lt.u32.totalorder %s4448_s11, %s4996_s0 }
  0x17   :  { %p4454_p10 = pnand %p4452_p9, %p4449_p8 }
  0x19   :  { %4457 = shalt.err (!%p4454_p10)
}
  0x1a   :  { %s4458_s16 = scalar_lea.vmem %s19_s8, 256  ;;  %p4463_p12 = scmp.lt.s32.totalorder %s19_s8, %s19_s8 }
  0x1b   :  { %p4459_p11 = scmp.ne.s32.totalorder %s19_s8, %s4458_s16  ;;  %p4464_p13 = scmp.lt.s32.totalorder %s4458_s16, %s4458_s16 }
  0x1d   :  { %p4465_p0 = por %p4464_p13, %p4463_p12 }
  0x1f   :  { %p4466_p1 = pnand %p4465_p0, %p4459_p11 }
  0x21   :  { %4469 = shalt.err (!%p4466_p1)
}
  0x22   :  { %s4524_s1 = smov 128   ;;  %s4525_s17 = smov 8  }
  0x23   :  { %24 = dma.hbm_to_vmem [thread:$0]  %s4996_s0, 256, %s19_s8, [#allocation3], %s4524_s1, %s4524_s1, %s4525_s17  }
  0x24   :  { %s4526_s20 = smov [#allocation7]   ;;  %s4470_s24 = scalar_lea.hbm %s4999_s3, 1024 }
  0x25   :  { %s44_s21 = sshll.u32 %s4526_s20, 4  ;;  %p4471_p2 = scmp.ne.s32.totalorder %s4999_s3, %s4470_s24  ;;  %s45_s21 = int_to_ptr.vmem [resolvable:$true] %s44_s21 }
  0x26   :  { %p4474_p3 = scmp.lt.u32.totalorder %s4470_s24, %s4999_s3 }
  0x28   :  { %p4476_p4 = pnand %p4474_p3, %p4471_p2 }
  0x2a   :  { %4479 = shalt.err (!%p4476_p4)
}
  0x2b   :  { %s4480_s30 = scalar_lea.vmem %s45_s21, 1024  ;;  %p4485_p6 = scmp.lt.s32.totalorder %s45_s21, %s45_s21 }
  0x2c   :  { %p4481_p5 = scmp.ne.s32.totalorder %s45_s21, %s4480_s30  ;;  %p4486_p7 = scmp.lt.s32.totalorder %s4480_s30, %s4480_s30 }
  0x2e   :  { %p4487_p8 = por %p4486_p7, %p4485_p6 }
  0x30   :  { %p4488_p9 = pnand %p4487_p8, %p4481_p5 }
  0x32   :  { %4491 = shalt.err (!%p4488_p9)
}
  0x33   :  { %50 = dma.hbm_to_vmem [thread:$0]  %s4999_s3, 1024, %s45_s21, [#allocation6], %s4524_s1, %s4524_s1, %s4525_s17  }
  0x34   :  { %4514 = dma.done.wait [#allocation3], 256  }
  0x35   :  { %4515 = vsyncadd [#allocation3], 4294967040 }
  0x36   :  { %4516 = dma.done.wait [#allocation6], 3072  }
  0x37   :  { %4517 = vsyncadd [#allocation6], 4294964224  ;;  %v4527_v0 = vmov 0.0   ;;  %v65_v1 = vld [vmem:[#allocation5 + $0x8] sm:$0xff]  ;;  %v67_v2 = vld [vmem:[#allocation5 + $0x18] sm:$0xff]  ;;  %vm92_vm0 = vcmask 523264   ;;  %v82_v27 = vlaneseq }
  0x38   :  { %163 = vmatprep.mubr.f32.mxu0 %v4527_v0  ;;  %4111 = vmatprep.subr.mxu1 %v4527_v0  ;;  %v64_v3 = vld [vmem:[#allocation5] sm:$0xff]  ;;  %v4351_v4 = vpack.c.bf16 %v67_v2, %v65_v1  ;;  %v66_v5 = vld [vmem:[#allocation5 + $0x10] sm:$0xff]  ;;  %v69_v6 = vld [vmem:[#allocation5 + $0x28] sm:$0xff]  ;;  %vm4528_vm1 = vmmov 0   ;;  %s4529_s8 = smov 120   ;;  %s4530_s9 = smov 64  }
  0x39   :  { %v71_v7 = vld [vmem:[#allocation5 + $0x38] sm:$0xff]  ;;  %v4353_v8 = vpack.c.bf16 %v66_v5, %v64_v3  ;;  %v68_v10 = vld [vmem:[#allocation5 + $0x20] sm:$0xff]  ;;  %v70_v11 = vld [vmem:[#allocation5 + $0x30] sm:$0xff]  ;;  %v83_v28 = vshrl.u32 %v82_v27, 7  ;;  %4113 = vmatprep.mubr.msk.f32.mxu1 %vm4528_vm1, %v4527_v0  ;;  %s4531_s10 = smov 48   ;;  %s4532_s11 = smov 56  }
  0x3a   :  { %v4355_v9 = vpack.c.bf16 %v71_v7, %v69_v6  ;;  %v73_v12 = vld [vmem:[#allocation5 + $0x48] sm:$0xff]  ;;  %4352 = vmatprep.subr.bf16.mxu0 %v4351_v4  ;;  %v75_v13 = vld [vmem:[#allocation5 + $0x58] sm:$0xff]  ;;  %v4357_v14 = vpack.c.bf16 %v70_v11, %v68_v10  ;;  %v72_v16 = vld [vmem:[#allocation5 + $0x40] sm:$0xff]  ;;  %s4533_s12 = smov 40   ;;  %s4535_s13 = smov 32   ;;  %vm188_vm2 = vcmask 64512  }
  0x3b   :  { %4354 = vmatpush1.bf16.msra.mxu0 %v4353_v8  ;;  %v4359_v15 = vpack.c.bf16 %v75_v13, %v73_v12  ;;  %v74_v17 = vld [vmem:[#allocation5 + $0x50] sm:$0xff]  ;;  %v77_v18 = vld [vmem:[#allocation5 + $0x68] sm:$0xff]  ;;  %v79_v19 = vld [vmem:[#allocation5 + $0x78] sm:$0xff]  ;;  %v84_v29 = vsub.s32 0, %v83_v28  ;;  %s4536_s14 = smov 104   ;;  %s4537_s15 = smov 96  }
  0x3c   :  { %4356 = vmatprep.subr.bf16.mxu0 %v4355_v9  ;;  %v4361_v20 = vpack.c.bf16 %v74_v17, %v72_v16  ;;  %v4363_v21 = vpack.c.bf16 %v79_v19, %v77_v18  ;;  %v76_v22 = vld [vmem:[#allocation5 + $0x60] sm:$0xff]  ;;  %v78_v23 = vld [vmem:[#allocation5 + $0x70] sm:$0xff]  ;;  %v63_v26 = vld [vmem:[#allocation2 + $0x8] sm:$0xff]  ;;  %s4538_s16 = smov 24   ;;  %v88_v35 = vsub.s32 1, %v83_v28  ;;  %s4539_s18 = smov 88  }
  0x3d   :  { %v4365_v24 = vpack.c.bf16 %v78_v23, %v76_v22  ;;  %v62_v25 = vld [vmem:[#allocation2] sm:$0xff]  ;;  %s4540_s19 = smov 80   ;;  %s4541_s20 = smov 72  }
  0x3e   :  { %v80_v30 = vld [vmem:[%s4998_s2] sm:$0x3]  ;;  %s4534_s2 = smov 112  }
  0x3f   :  { %4358 = vmatpush1.bf16.msra.mxu0 %v4357_v14  ;;  %v85_v31 = vrot.slane %v80_v30, %v84_v29  ;;  %v4641_v36 = vrot.slane %v80_v30, %v88_v35 }
  0x40   :  { %4360 = vmatprep.subr.bf16.mxu0 %v4359_v15 }
  0x43   :  { %4362 = vmatpush1.bf16.msra.mxu0 %v4361_v20 }
  0x44   :  { %4364 = vmatprep.subr.bf16.mxu0 %v4363_v21 }
  0x47   :  { %4366 = vmatpush1.bf16.msra.mxu0 %v4365_v24 }
  0x48   :  { %4136 = vmatprep.subr.mxu0 %v4527_v0 }
  0x4a   :  { %3948 = vmatmul.mubr.msk.f32.vlgmr.msra.gmra.mrb[0].mxu0 %vm92_vm0, %v62_v25 }
  0x4b   :  { %169 = vmatprep.mubr.f32.mxu0 %v4527_v0 }
  0x4e   :  { %3949 = vmatmul.mubr.msk.f32.gmra.mrb[2].mxu0 %vm92_vm0, %v63_v26 }
  0x4f   :  { %4138 = vmatprep.mubr.msk.f32.mxu0 %vm4528_vm1, %v4527_v0 }
 0x11d   :  { %v165_v32 = vpop.f32.mrb[0].mxu0 }
 0x11e   :  { %v166_v33 = vadd.f32 %v165_v32, %v85_v31  ;;  %v167_v34 = vpop.f32.mrb[1].mxu0 }
 0x11f   :  { %v168_v37 = vadd.f32 %v167_v34, %v4641_v36 }
 0x120   :  { %263 = vrot.lane.b32.xlu1 %v166_v33, %s4529_s8  ;;  %186 = vrot.lane.b32.xlu0 %v166_v33, %s4530_s9 }
 0x121   :  { %v171_v44 = vpop.f32.mrb[2].mxu0 }
 0x122   :  { %v4666_v45 = vadd.f32 %v171_v44, %v85_v31  ;;  %v173_v56 = vpop.f32.mrb[3].mxu0 }
 0x123   :  { %v4729_v57 = vadd.f32 %v173_v56, %v4641_v36 }
 0x124   :  { %343 = vrot.lane.b32.xlu1 %v166_v33, %s4531_s10  ;;  %265 = vrot.lane.b32.xlu0 %v166_v33, %s4532_s11 }
 0x128   :  { %421 = vrot.lane.b32.xlu1 %v166_v33, %s4533_s12  ;;  %341 = vrot.lane.b32.xlu0 %v166_v33, %s4534_s2 }
 0x12c   :  { %499 = vrot.lane.b32.xlu1 %v166_v33, %s4535_s13  ;;  %419 = vrot.lane.b32.xlu0 %v166_v33, %s4536_s14 }
 0x130   :  { %497 = vrot.lane.b32.xlu1 %v166_v33, %s4537_s15  ;;  %577 = vrot.lane.b32.xlu0 %v166_v33, %s4538_s16 }
 0x134   :  { %575 = vrot.lane.b32.xlu1 %v166_v33, %s4539_s18  ;;  %655 = vrot.lane.b32.xlu0 %v166_v33, %s4522_s29 }
 0x138   :  { %653 = vrot.lane.b32.xlu1 %v166_v33, %s4540_s19  ;;  %733 = vrot.lane.b32.xlu0 %v166_v33, %s4525_s17 }
 0x13c   :  { %925 = vrot.lane.b32.xlu1 %v168_v37, %s4529_s8  ;;  %731 = vrot.lane.b32.xlu0 %v166_v33, %s4541_s20 }
 0x140   :  { %1299 = vrot.lane.b32.xlu1 %v168_v37, %s4536_s14  ;;  %1148 = vrot.lane.b32.xlu0 %v168_v37, %s4534_s2 }
 0x144   :  { %1601 = vrot.lane.b32.xlu1 %v168_v37, %s4539_s18  ;;  %1450 = vrot.lane.b32.xlu0 %v168_v37, %s4537_s15 }
 0x148   :  { %1903 = vrot.lane.b32.xlu1 %v168_v37, %s4541_s20  ;;  %1752 = vrot.lane.b32.xlu0 %v168_v37, %s4540_s19 }
 0x14c   :  { %2140 = vrot.lane.b32.xlu1 %v4666_v45, %s4532_s11  ;;  %2062 = vrot.lane.b32.xlu0 %v4666_v45, %s4530_s9 }
 0x150   :  { %2138 = vrot.lane.b32.xlu1 %v4666_v45, %s4529_s8  ;;  %2218 = vrot.lane.b32.xlu0 %v4666_v45, %s4531_s10 }
 0x154   :  { %2216 = vrot.lane.b32.xlu1 %v4666_v45, %s4534_s2  ;;  %2296 = vrot.lane.b32.xlu0 %v4666_v45, %s4533_s12 }
 0x158   :  { %2294 = vrot.lane.b32.xlu1 %v4666_v45, %s4536_s14  ;;  %2374 = vrot.lane.b32.xlu0 %v4666_v45, %s4535_s13 }
 0x15c   :  { %2372 = vrot.lane.b32.xlu1 %v4666_v45, %s4537_s15  ;;  %2452 = vrot.lane.b32.xlu0 %v4666_v45, %s4538_s16 }
 0x160   :  { %2450 = vrot.lane.b32.xlu1 %v4666_v45, %s4539_s18  ;;  %2530 = vrot.lane.b32.xlu0 %v4666_v45, %s4522_s29 }
 0x164   :  { %2528 = vrot.lane.b32.xlu1 %v4666_v45, %s4540_s19  ;;  %2608 = vrot.lane.b32.xlu0 %v4666_v45, %s4525_s17 }
 0x168   :  { %2606 = vrot.lane.b32.xlu0 %v4666_v45, %s4541_s20  ;;  %2800 = vrot.lane.b32.xlu1 %v4729_v57, %s4529_s8 }
 0x16c   :  { %3023 = vrot.lane.b32.xlu0 %v4729_v57, %s4534_s2  ;;  %3174 = vrot.lane.b32.xlu1 %v4729_v57, %s4536_s14 }
 0x170   :  { %3325 = vrot.lane.b32.xlu0 %v4729_v57, %s4537_s15  ;;  %3476 = vrot.lane.b32.xlu1 %v4729_v57, %s4539_s18 }
 0x174   :  { %3627 = vrot.lane.b32.xlu0 %v4729_v57, %s4540_s19  ;;  %3778 = vrot.lane.b32.xlu1 %v4729_v57, %s4541_s20 }
 0x192   :  { %v264_v38 = vpop.permute.xlu1 %263  ;;  %v187_v39 = vpop.permute.xlu0 %186 }
 0x193   :  { %4112 = vmatpush3.xpose.msk.msra.mxu1 %vm188_vm2, %v187_v39 }
 0x194   :  { %4116 = vmatprep.subr.mxu1 %v4527_v0 }
 0x196   :  { %v344_v40 = vpop.permute.xlu1 %343  ;;  %4114 = vmatmul.mubr.msk.f32.vlgmr.msra.gmra.mrb[0].mxu1 %vm188_vm2, %v166_v33  ;;  %v266_v41 = vpop.permute.xlu0 %265 }
 0x197   :  { %4117 = vmatpush3.xpose.msk.msra.mxu1 %vm188_vm2, %v266_v41  ;;  %4118 = vmatprep.mubr.msk.f32.mxu1 %vm4528_vm1, %v4527_v0 }
 0x198   :  { %4121 = vmatprep.subr.mxu1 %v4527_v0 }
 0x19a   :  { %v422_v42 = vpop.permute.xlu1 %421  ;;  %4119 = vmatmul.mubr.msk.f32.vlgmr.msra.gmra.mrb[2].mxu1 %vm188_vm2, %v264_v38  ;;  %v342_v43 = vpop.permute.xlu0 %341 }
 0x19b   :  { %4122 = vmatpush3.xpose.msk.msra.mxu1 %vm188_vm2, %v344_v40  ;;  %4123 = vmatprep.mubr.msk.f32.mxu1 %vm4528_vm1, %v4527_v0 }
 0x19c   :  { %4126 = vmatprep.subr.mxu1 %v4527_v0 }
 0x19e   :  { %v500_v46 = vpop.permute.xlu1 %499  ;;  %4124 = vmatmul.mubr.msk.f32.vlgmr.msra.gmra.mrb[4].mxu1 %vm188_vm2, %v342_v43  ;;  %v420_v47 = vpop.permute.xlu0 %419 }
 0x19f   :  { %4127 = vmatpush3.xpose.msk.msra.mxu1 %vm188_vm2, %v422_v42  ;;  %4128 = vmatprep.mubr.msk.f32.mxu1 %vm4528_vm1, %v4527_v0 }
 0x1a0   :  { %4131 = vmatprep.subr.mxu1 %v4527_v0 }
 0x1a2   :  { %v498_v48 = vpop.permute.xlu1 %497  ;;  %4129 = vmatmul.mubr.msk.f32.vlgmr.msra.gmra.mrb[6].mxu1 %vm188_vm2, %v420_v47  ;;  %v578_v49 = vpop.permute.xlu0 %577 }
 0x1a3   :  { %4132 = vmatpush3.xpose.msk.msra.mxu1 %vm188_vm2, %v500_v46  ;;  %4137 = vmatpush3.xpose.msk.msra.mxu0 %vm188_vm2, %v578_v49 }
 0x1a4   :  { %4133 = vmatprep.mubr.msk.f32.mxu1 %vm4528_vm1, %v4527_v0  ;;  %4141 = vmatprep.subr.mxu1 %v4527_v0 }
 0x1a5   :  { %4146 = vmatprep.subr.mxu0 %v4527_v0 }
 0x1a6   :  { %v576_v50 = vpop.permute.xlu1 %575  ;;  %4134 = vmatmul.mubr.msk.f32.vlgmr.msra.gmra.mrb[8].mxu1 %vm188_vm2, %v498_v48  ;;  %v656_v51 = vpop.permute.xlu0 %655 }
 0x1a7   :  { %4139 = vmatmul.mubr.msk.f32.vlgmr.msra.gmra.mrb[4].mxu0 %vm188_vm2, %v576_v50  ;;  %4142 = vmatpush3.xpose.msk.msra.mxu1 %vm188_vm2, %v656_v51 }
 0x1a8   :  { %4143 = vmatprep.mubr.msk.f32.mxu1 %vm4528_vm1, %v4527_v0  ;;  %4151 = vmatprep.subr.mxu1 %v4527_v0 }
 0x1a9   :  { %4148 = vmatprep.mubr.msk.f32.mxu0 %vm4528_vm1, %v4527_v0 }
 0x1aa   :  { %v654_v52 = vpop.permute.xlu1 %653  ;;  %v734_v53 = vpop.permute.xlu0 %733 }
 0x1ab   :  { %4144 = vmatmul.mubr.msk.f32.vlgmr.msra.gmra.mrb[10].mxu1 %vm188_vm2, %v654_v52  ;;  %4147 = vmatpush3.xpose.msk.msra.mxu0 %vm188_vm2, %v734_v53 }
 0x1ac   :  { %4152 = vmatpush3.msra.mxu1 %v168_v37  ;;  %4156 = vmatprep.subr.mxu0 %v4527_v0 }
 0x1ad   :  { %4153 = vmatprep.mubr.msk.f32.mxu1 %vm4528_vm1, %v4527_v0  ;;  %4161 = vmatprep.subr.mxu1 %v4527_v0 }
 0x1ae   :  { %v926_v54 = vpop.permute.xlu1 %925  ;;  %v732_v55 = vpop.permute.xlu0 %731 }
 0x1af   :  { %4149 = vmatmul.mubr.msk.f32.vlgmr.msra.gmra.mrb[6].mxu0 %vm188_vm2, %v732_v55 }
 0x1b0   :  { %4157 = vmatpush3.msra.mxu0 %v926_v54  ;;  %4158 = vmatprep.mubr.msk.f32.mxu0 %vm4528_vm1, %v4527_v0  ;;  %v4745_v54 = vld [vmem:[#allocation7 + $0x8] sm:$0xff] }
 0x1b1   :  { %4166 = vmatprep.subr.mxu0 %v4527_v0 }
 0x269   :  { %v259_v58 = vpop.f32.mrb[0].mxu1 }
 0x26a   :  { %v4115_v59 = vpop.f32.mrb[1].mxu1 }
 0x26d   :  { %v337_v60 = vpop.f32.mrb[2].mxu1 }
 0x26e   :  { %v809_v61 = vmax.f32 %v259_v58, %v337_v60  ;;  %v4120_v62 = vpop.f32.mrb[3].mxu1 }
 0x26f   :  { %v4755_v62 = vld [vmem:[#allocation7] sm:$0xff] }
 0x271   :  { %v415_v63 = vpop.f32.mrb[4].mxu1 }
 0x272   :  { %v810_v1 = vmax.f32 %v809_v61, %v415_v63  ;;  %v4125_v2 = vpop.f32.mrb[5].mxu1 }
 0x275   :  { %v493_v3 = vpop.f32.mrb[6].mxu1 }
 0x276   :  { %v811_v4 = vmax.f32 %v810_v1, %v493_v3  ;;  %v4130_v5 = vpop.f32.mrb[7].mxu1  ;;  %v1149_v1 = vpop.permute.xlu0 %1148 }
 0x279   :  { %v571_v6 = vpop.f32.mrb[8].mxu1 }
 0x27a   :  { %v812_v7 = vmax.f32 %v811_v4, %v571_v6  ;;  %v4135_v8 = vpop.f32.mrb[9].mxu1  ;;  %v649_v9 = vpop.f32.mrb[4].mxu0 }
 0x27b   :  { %v4140_v10 = vpop.f32.mrb[5].mxu0 }
 0x27c   :  { %v813_v11 = vmax.f32 %v812_v7, %v649_v9 }
 0x27e   :  { %v727_v12 = vpop.f32.mrb[10].mxu1 }
 0x27f   :  { %v814_v13 = vmax.f32 %v813_v11, %v727_v12  ;;  %v4145_v14 = vpop.f32.mrb[11].mxu1 }
 0x282   :  { %v805_v15 = vpop.f32.mrb[6].mxu0 }
 0x283   :  { %v815_v16 = vmax.f32 %v814_v13, %v805_v15  ;;  %v4150_v17 = vpop.f32.mrb[7].mxu0 }
 0x285   :  { %v816_v18 = vsub.f32 %v259_v58, %v815_v16  ;;  %v819_v19 = vsub.f32 %v337_v60, %v815_v16  ;;  %v822_v20 = vsub.f32 %v415_v63, %v815_v16  ;;  %v825_v21 = vsub.f32 %v493_v3, %v815_v16  ;;  %v1300_v63 = vpop.permute.xlu1 %1299  ;;  %v1451_v3 = vpop.permute.xlu0 %1450 }
 0x286   :  { %v828_v22 = vsub.f32 %v571_v6, %v815_v16  ;;  %v831_v23 = vsub.f32 %v649_v9, %v815_v16  ;;  %v834_v24 = vsub.f32 %v727_v12, %v815_v16  ;;  %v837_v25 = vsub.f32 %v805_v15, %v815_v16 }
 0x287   :  { %v817_v26 = vmul.f32 1.442695, %v816_v18  ;;  %v820_v27 = vmul.f32 1.442695, %v819_v19  ;;  %v823_v28 = vmul.f32 1.442695, %v822_v20 }
 0x288   :  { %v826_v29 = vmul.f32 1.442695, %v825_v21  ;;  %v829_v30 = vmul.f32 1.442695, %v828_v22  ;;  %v832_v31 = vmul.f32 1.442695, %v831_v23 }
 0x289   :  { %4390 = vpow2.f32 %v817_v26  ;;  %v835_v32 = vmul.f32 1.442695, %v834_v24  ;;  %v838_v33 = vmul.f32 1.442695, %v837_v25  ;;  %v1602_v2 = vpop.permute.xlu1 %1601  ;;  %v1753_v9 = vpop.permute.xlu0 %1752  ;;  %v4824_v22 = vld [vmem:[#allocation7 + $0x10] sm:$0xff] }
 0x28a   :  { %4392 = vpow2.f32 %v820_v27 }
 0x28b   :  { %4394 = vpow2.f32 %v823_v28  ;;  %v4830_v28 = vld [vmem:[#allocation7 + $0x18] sm:$0xff] }
 0x28c   :  { %4396 = vpow2.f32 %v826_v29 }
 0x28d   :  { %4398 = vpow2.f32 %v829_v30  ;;  %v1904_v8 = vpop.permute.xlu1 %1903  ;;  %v2063_v11 = vpop.permute.xlu0 %2062  ;;  %v4837_v30 = vld [vmem:[#allocation7 + $0x20] sm:$0xff] }
 0x28e   :  { %4400 = vpow2.f32 %v832_v31 }
 0x28f   :  { %4402 = vpow2.f32 %v835_v32 }
 0x290   :  { %4404 = vpow2.f32 %v838_v33  ;;  %v4844_v33 = vld [vmem:[#allocation7 + $0x28] sm:$0xff] }
 0x291   :  { %v4769_v10 = vpop.permute.xlu1 %2140  ;;  %v2219_v13 = vpop.permute.xlu0 %2218 }
 0x293   :  { %v4391_v34 = vpop.eup %4390 }
 0x294   :  { %v4393_v35 = vpop.eup %4392 }
 0x295   :  { %v840_v36 = vadd.f32 %v4393_v35, %v4391_v34  ;;  %v4395_v37 = vpop.eup %4394  ;;  %v4776_v12 = vpop.permute.xlu1 %2138 }
 0x296   :  { %v4397_v39 = vpop.eup %4396  ;;  %v4787_v15 = vpop.permute.xlu0 %2296 }
 0x297   :  { %v841_v38 = vadd.f32 %v4395_v37, %v840_v36  ;;  %v4399_v41 = vpop.eup %4398  ;;  %v4851_v36 = vld [vmem:[#allocation7 + $0x30] sm:$0xff] }
 0x298   :  { %v4401_v43 = vpop.eup %4400 }
 0x299   :  { %v842_v40 = vadd.f32 %v4397_v39, %v841_v38  ;;  %v4403_v46 = vpop.eup %4402  ;;  %v2217_v14 = vpop.permute.xlu1 %2216 }
 0x29a   :  { %v4405_v48 = vpop.eup %4404  ;;  %v2375_v17 = vpop.permute.xlu0 %2374 }
 0x29b   :  { %v843_v42 = vadd.f32 %v4399_v41, %v842_v40 }
 0x29d   :  { %v844_v44 = vadd.f32 %v4401_v43, %v843_v42  ;;  %v4792_v16 = vpop.permute.xlu1 %2294 }
 0x29e   :  { %v4804_v19 = vpop.permute.xlu0 %2452 }
 0x29f   :  { %v845_v47 = vadd.f32 %v4403_v46, %v844_v44 }
 0x2a1   :  { %v846_v49 = vadd.f32 %v4405_v48, %v845_v47  ;;  %v2373_v18 = vpop.permute.xlu1 %2372 }
 0x2a3   :  { %v847_v50 = vmul.f32 8.0, %v846_v49 }
 0x2a5   :  { %4406 = vrcp.f32 %v847_v50  ;;  %v4808_v20 = vpop.permute.xlu1 %2450 }
 0x2a9   :  { %v2529_v21 = vpop.permute.xlu1 %2528 }
 0x2af   :  { %v4407_v51 = vpop.eup %4406 }
 0x2b0   :  { %v849_v52 = vmul.f32 %v4407_v51, %v4391_v34  ;;  %v923_v53 = vmul.f32 %v4407_v51, %v4393_v35  ;;  %v1147_v55 = vmul.f32 %v4407_v51, %v4395_v37  ;;  %v1298_v56 = vmul.f32 %v4407_v51, %v4397_v39  ;;  %v4858_v39 = vld [vmem:[#allocation7 + $0x38] sm:$0xff] }
 0x2b1   :  { %v1449_v58 = vmul.f32 %v4407_v51, %v4399_v41  ;;  %v1600_v59 = vmul.f32 %v4407_v51, %v4401_v43  ;;  %v1751_v60 = vmul.f32 %v4407_v51, %v4403_v46  ;;  %v1902_v61 = vmul.f32 %v4407_v51, %v4405_v48 }
 0x2b2   :  { %4154 = vmatmul.mubr.msk.f32.vlgmr.msra.gmra.mrb[12].mxu1 %vm188_vm2, %v849_v52  ;;  %4159 = vmatmul.mubr.msk.f32.vlgmr.msra.gmra.mrb[8].mxu0 %vm188_vm2, %v923_v53 }
 0x2b3   :  { %4162 = vmatpush3.msra.mxu1 %v4745_v54  ;;  %4163 = vmatprep.mubr.msk.f32.mxu1 %vm4528_vm1, %v4527_v0 }
 0x2b4   :  { %4168 = vmatprep.mubr.msk.f32.mxu0 %vm4528_vm1, %v4527_v0  ;;  %4171 = vmatprep.subr.mxu1 %v4527_v0 }
 0x2b5   :  { %4167 = vmatpush3.msra.mxu0 %v4755_v62 }
 0x2b6   :  { %4176 = vmatprep.subr.mxu0 %v4527_v0 }
 0x385   :  { %v919_v4 = vpop.f32.mrb[12].mxu1  ;;  %v997_v5 = vpop.f32.mrb[8].mxu0 }
 0x386   :  { %v4155_v6 = vpop.f32.mrb[13].mxu1  ;;  %v4160_v7 = vpop.f32.mrb[9].mxu0  ;;  %4164 = vmatmul.mubr.msk.f32.vlgmr.msra.gmra.mrb[14].mxu1 %vm188_vm2, %v997_v5  ;;  %4169 = vmatmul.mubr.msk.f32.vlgmr.msra.gmra.mrb[10].mxu0 %vm188_vm2, %v919_v4 }
 0x387   :  { %4172 = vmatpush3.msra.mxu1 %v1149_v1  ;;  %4173 = vmatprep.mubr.msk.f32.mxu1 %vm4528_vm1, %v4527_v0 }
 0x388   :  { %4181 = vmatprep.subr.mxu1 %v4527_v0  ;;  %4178 = vmatprep.mubr.msk.f32.mxu0 %vm4528_vm1, %v4527_v0 }
 0x389   :  { %4177 = vmatpush3.msra.mxu0 %v4824_v22 }
 0x38a   :  { %4174 = vmatmul.mubr.msk.f32.vlgmr.msra.gmra.mrb[16].mxu1 %vm188_vm2, %v1147_v55  ;;  %4186 = vmatprep.subr.mxu0 %v4527_v0  ;;  %v2801_v55 = vpop.permute.xlu1 %2800 }
 0x38b   :  { %4182 = vmatpush3.msra.mxu1 %v1300_v63  ;;  %4183 = vmatprep.mubr.msk.f32.mxu1 %vm4528_vm1, %v4527_v0 }
 0x38c   :  { %4191 = vmatprep.subr.mxu1 %v4527_v0 }
 0x38e   :  { %4184 = vmatmul.mubr.msk.f32.vlgmr.msra.gmra.mrb[18].mxu1 %vm188_vm2, %v1298_v56 }
 0x38f   :  { %4192 = vmatpush3.msra.mxu1 %v1451_v3  ;;  %4193 = vmatprep.mubr.msk.f32.mxu1 %vm4528_vm1, %v4527_v0 }
 0x390   :  { %4201 = vmatprep.subr.mxu1 %v4527_v0 }
 0x392   :  { %4194 = vmatmul.mubr.msk.f32.vlgmr.msra.gmra.mrb[20].mxu1 %vm188_vm2, %v1449_v58 }
 0x393   :  { %4202 = vmatpush3.msra.mxu1 %v1602_v2  ;;  %4203 = vmatprep.mubr.msk.f32.mxu1 %vm4528_vm1, %v4527_v0 }
 0x394   :  { %4211 = vmatprep.subr.mxu1 %v4527_v0 }
 0x396   :  { %4204 = vmatmul.mubr.msk.f32.vlgmr.msra.gmra.mrb[22].mxu1 %vm188_vm2, %v1600_v59 }
 0x397   :  { %4212 = vmatpush3.msra.mxu1 %v1753_v9  ;;  %4213 = vmatprep.mubr.msk.f32.mxu1 %vm4528_vm1, %v4527_v0 }
 0x398   :  { %4221 = vmatprep.subr.mxu1 %v4527_v0 }
 0x39a   :  { %4214 = vmatmul.mubr.msk.f32.vlgmr.msra.gmra.mrb[24].mxu1 %vm188_vm2, %v1751_v60 }
 0x39b   :  { %4222 = vmatpush3.msra.mxu1 %v1904_v8  ;;  %4223 = vmatprep.mubr.msk.f32.mxu1 %vm4528_vm1, %v4527_v0 }
 0x39c   :  { %4231 = vmatprep.subr.mxu1 %v4527_v0 }
 0x39e   :  { %4224 = vmatmul.mubr.msk.f32.vlgmr.msra.gmra.mrb[26].mxu1 %vm188_vm2, %v1902_v61 }
 0x39f   :  { %4233 = vmatprep.mubr.msk.f32.mxu1 %vm4528_vm1, %v4527_v0 }
 0x3a2   :  { %4232 = vmatpush3.xpose.msk.msra.mxu1 %vm188_vm2, %v2063_v11  ;;  %v4905_v11 = vld [vmem:[%s5000_s4] ss:$0 sm:$0xff]  ;;  %s4542_s4 = smov [#allocation8]  }
 0x3a3   :  { %4241 = vmatprep.subr.mxu1 %v4527_v0  ;;  %s3935_s22 = sshll.u32 %s4542_s4, 4  ;;  %s3936_s22 = int_to_ptr.vmem [resolvable:$true] %s3935_s22 }
 0x3a4   :  { %s4492_s23 = scalar_lea.vmem %s3936_s22, 256  ;;  %p4497_p11 = scmp.lt.s32.totalorder %s3936_s22, %s3936_s22 }
 0x3a5   :  { %4234 = vmatmul.mubr.msk.f32.vlgmr.msra.gmra.mrb[28].mxu1 %vm188_vm2, %v4666_v45  ;;  %v2531_v45 = vpop.permute.xlu0 %2530  ;;  %p4493_p10 = scmp.ne.s32.totalorder %s3936_s22, %s4492_s23  ;;  %p4498_p12 = scmp.lt.s32.totalorder %s4492_s23, %s4492_s23 }
 0x3a6   :  { %4242 = vmatpush3.xpose.msk.msra.mxu1 %vm188_vm2, %v2219_v13  ;;  %4243 = vmatprep.mubr.msk.f32.mxu1 %vm4528_vm1, %v4527_v0 }
 0x3a7   :  { %4251 = vmatprep.subr.mxu1 %v4527_v0  ;;  %p4499_p13 = por %p4498_p12, %p4497_p11 }
 0x3a9   :  { %4244 = vmatmul.mubr.msk.f32.vlgmr.msra.gmra.mrb[30].mxu1 %vm188_vm2, %v2217_v14  ;;  %v2609_v49 = vpop.permute.xlu0 %2608  ;;  %p4500_p0 = pnand %p4499_p13, %p4493_p10 }
 0x3aa   :  { %4252 = vmatpush3.xpose.msk.msra.mxu1 %vm188_vm2, %v2375_v17  ;;  %4253 = vmatprep.mubr.msk.f32.mxu1 %vm4528_vm1, %v4527_v0 }
 0x3ab   :  { %4261 = vmatprep.subr.mxu1 %v4527_v0 }
 0x3ad   :  { %4254 = vmatmul.mubr.msk.f32.vlgmr.msra.gmra.mrb[32].mxu1 %vm188_vm2, %v2373_v18  ;;  %v2607_v52 = vpop.permute.xlu0 %2606 }
 0x3ae   :  { %4262 = vmatpush3.xpose.msk.msra.mxu1 %vm188_vm2, %v2531_v45  ;;  %4263 = vmatprep.mubr.msk.f32.mxu1 %vm4528_vm1, %v4527_v0 }
 0x3af   :  { %4271 = vmatprep.subr.mxu1 %v4527_v0 }
 0x3b1   :  { %4264 = vmatmul.mubr.msk.f32.vlgmr.msra.gmra.mrb[34].mxu1 %vm188_vm2, %v2529_v21 }
 0x3b2   :  { %4272 = vmatpush3.msra.mxu1 %v4729_v57  ;;  %4273 = vmatprep.mubr.msk.f32.mxu1 %vm4528_vm1, %v4527_v0 }
 0x3b3   :  { %4281 = vmatprep.subr.mxu1 %v4527_v0 }
 0x459   :  { %v1070_v23 = vpop.f32.mrb[14].mxu1  ;;  %v1143_v24 = vpop.f32.mrb[10].mxu0 }
 0x45a   :  { %v4828_v25 = vadd.f32 %v1143_v24, %v1070_v23  ;;  %v4165_v26 = vpop.f32.mrb[15].mxu1  ;;  %v4170_v27 = vpop.f32.mrb[11].mxu0 }
 0x45d   :  { %v1220_v57 = vpop.f32.mrb[16].mxu1 }
 0x45e   :  { %v4175_v29 = vpop.f32.mrb[17].mxu1  ;;  %4179 = vmatmul.mubr.msk.f32.vlgmr.msra.gmra.mrb[12].mxu0 %vm188_vm2, %v1220_v57 }
 0x45f   :  { %4187 = vmatpush3.msra.mxu0 %v4830_v28  ;;  %4188 = vmatprep.mubr.msk.f32.mxu0 %vm4528_vm1, %v4527_v0 }
 0x460   :  { %4196 = vmatprep.subr.mxu0 %v4527_v0 }
 0x461   :  { %v1371_v31 = vpop.f32.mrb[18].mxu1 }
 0x462   :  { %v4185_v32 = vpop.f32.mrb[19].mxu1  ;;  %4189 = vmatmul.mubr.msk.f32.vlgmr.msra.gmra.mrb[14].mxu0 %vm188_vm2, %v1371_v31 }
 0x463   :  { %4197 = vmatpush3.msra.mxu0 %v4837_v30  ;;  %4198 = vmatprep.mubr.msk.f32.mxu0 %vm4528_vm1, %v4527_v0 }
 0x464   :  { %4206 = vmatprep.subr.mxu0 %v4527_v0 }
 0x465   :  { %v1522_v34 = vpop.f32.mrb[20].mxu1 }
 0x466   :  { %v4195_v35 = vpop.f32.mrb[21].mxu1  ;;  %4199 = vmatmul.mubr.msk.f32.vlgmr.msra.gmra.mrb[16].mxu0 %vm188_vm2, %v1522_v34 }
 0x467   :  { %4207 = vmatpush3.msra.mxu0 %v4844_v33  ;;  %4208 = vmatprep.mubr.msk.f32.mxu0 %vm4528_vm1, %v4527_v0 }
 0x468   :  { %4216 = vmatprep.subr.mxu0 %v4527_v0 }
 0x469   :  { %v1673_v37 = vpop.f32.mrb[22].mxu1 }
 0x46a   :  { %v4205_v38 = vpop.f32.mrb[23].mxu1  ;;  %4209 = vmatmul.mubr.msk.f32.vlgmr.msra.gmra.mrb[18].mxu0 %vm188_vm2, %v1673_v37 }
 0x46b   :  { %4217 = vmatpush3.msra.mxu0 %v4851_v36  ;;  %4218 = vmatprep.mubr.msk.f32.mxu0 %vm4528_vm1, %v4527_v0 }
 0x46c   :  { %4226 = vmatprep.subr.mxu0 %v4527_v0 }
 0x46d   :  { %v1824_v40 = vpop.f32.mrb[24].mxu1 }
 0x46e   :  { %v4215_v41 = vpop.f32.mrb[25].mxu1  ;;  %4219 = vmatmul.mubr.msk.f32.vlgmr.msra.gmra.mrb[20].mxu0 %vm188_vm2, %v1824_v40 }
 0x46f   :  { %4227 = vmatpush3.msra.mxu0 %v4858_v39  ;;  %4228 = vmatprep.mubr.msk.f32.mxu0 %vm4528_vm1, %v4527_v0 }
 0x470   :  { %4236 = vmatprep.subr.mxu0 %v4527_v0 }
 0x471   :  { %v1975_v42 = vpop.f32.mrb[26].mxu1 }
 0x472   :  { %v4225_v43 = vpop.f32.mrb[27].mxu1  ;;  %4229 = vmatmul.mubr.msk.f32.vlgmr.msra.gmra.mrb[22].mxu0 %vm188_vm2, %v1975_v42 }
 0x473   :  { %4238 = vmatprep.mubr.msk.f32.mxu0 %vm4528_vm1, %v4527_v0 }
 0x476   :  { %4237 = vmatpush3.xpose.msk.msra.mxu0 %vm188_vm2, %v4769_v10 }
 0x477   :  { %4246 = vmatprep.subr.mxu0 %v4527_v0 }
 0x478   :  { %v4871_v44 = vpop.f32.mrb[28].mxu1 }
 0x479   :  { %v4235_v46 = vpop.f32.mrb[29].mxu1  ;;  %4239 = vmatmul.mubr.msk.f32.vlgmr.msra.gmra.mrb[24].mxu0 %vm188_vm2, %v4776_v12 }
 0x47a   :  { %4247 = vmatpush3.xpose.msk.msra.mxu0 %vm188_vm2, %v4787_v15  ;;  %4248 = vmatprep.mubr.msk.f32.mxu0 %vm4528_vm1, %v4527_v0 }
 0x47b   :  { %4256 = vmatprep.subr.mxu0 %v4527_v0 }
 0x47c   :  { %v4880_v47 = vpop.f32.mrb[30].mxu1 }
 0x47d   :  { %v4245_v48 = vpop.f32.mrb[31].mxu1  ;;  %4249 = vmatmul.mubr.msk.f32.vlgmr.msra.gmra.mrb[26].mxu0 %vm188_vm2, %v4792_v16 }
 0x47e   :  { %4257 = vmatpush3.xpose.msk.msra.mxu0 %vm188_vm2, %v4804_v19  ;;  %4258 = vmatprep.mubr.msk.f32.mxu0 %vm4528_vm1, %v4527_v0 }
 0x47f   :  { %4266 = vmatprep.subr.mxu0 %v4527_v0 }
 0x480   :  { %v4889_v50 = vpop.f32.mrb[32].mxu1 }
 0x481   :  { %v4255_v51 = vpop.f32.mrb[33].mxu1  ;;  %4259 = vmatmul.mubr.msk.f32.vlgmr.msra.gmra.mrb[28].mxu0 %vm188_vm2, %v4808_v20 }
 0x482   :  { %4267 = vmatpush3.xpose.msk.msra.mxu0 %vm188_vm2, %v2609_v49  ;;  %4268 = vmatprep.mubr.msk.f32.mxu0 %vm4528_vm1, %v4527_v0 }
 0x483   :  { %4276 = vmatprep.subr.mxu0 %v4527_v0 }
 0x484   :  { %v2602_v53 = vpop.f32.mrb[34].mxu1 }
 0x485   :  { %v4265_v56 = vpop.f32.mrb[35].mxu1  ;;  %4269 = vmatmul.mubr.msk.f32.vlgmr.msra.gmra.mrb[30].mxu0 %vm188_vm2, %v2607_v52 }
 0x486   :  { %4277 = vmatpush3.msra.mxu0 %v2801_v55  ;;  %4278 = vmatprep.mubr.msk.f32.mxu0 %vm4528_vm1, %v4527_v0 }
 0x487   :  { %4286 = vmatprep.subr.mxu0 %v4527_v0 }
 0x531   :  { %v1293_v58 = vpop.f32.mrb[12].mxu0 }
 0x532   :  { %v1297_v59 = vadd.f32 %v1293_v58, %v4828_v25  ;;  %v4180_v60 = vpop.f32.mrb[13].mxu0 }
 0x535   :  { %v1444_v61 = vpop.f32.mrb[14].mxu0 }
 0x536   :  { %v1448_v63 = vadd.f32 %v1444_v61, %v1297_v59  ;;  %v4190_v1 = vpop.f32.mrb[15].mxu0 }
 0x539   :  { %v1595_v2 = vpop.f32.mrb[16].mxu0 }
 0x53a   :  { %v1599_v3 = vadd.f32 %v1595_v2, %v1448_v63  ;;  %v4200_v4 = vpop.f32.mrb[17].mxu0 }
 0x53d   :  { %v1746_v5 = vpop.f32.mrb[18].mxu0 }
 0x53e   :  { %v1750_v6 = vadd.f32 %v1746_v5, %v1599_v3  ;;  %v4210_v7 = vpop.f32.mrb[19].mxu0 }
 0x541   :  { %v1897_v8 = vpop.f32.mrb[20].mxu0 }
 0x542   :  { %v1901_v9 = vadd.f32 %v1897_v8, %v1750_v6  ;;  %v4220_v10 = vpop.f32.mrb[21].mxu0 }
 0x545   :  { %v2048_v12 = vpop.f32.mrb[22].mxu0 }
 0x546   :  { %v2052_v13 = vadd.f32 %v2048_v12, %v1901_v9  ;;  %v4230_v14 = vpop.f32.mrb[23].mxu0 }
 0x548   :  { %v2059_v15 = vadd.f32 %v4905_v11, %v2052_v13 }
 0x54a   :  { %2060 = vst.msk [vmem:[#allocation8] sm:$0xff] %vm92_vm0, %v2059_v15 }
 0x54c   :  { %v2212_v16 = vpop.f32.mrb[24].mxu0 }
 0x54d   :  { %v2684_v17 = vmax.f32 %v4871_v44, %v2212_v16  ;;  %v4240_v18 = vpop.f32.mrb[25].mxu0 }
 0x54e   :  { %v3024_v18 = vpop.permute.xlu0 %3023 }
 0x54f   :  { %v2685_v19 = vmax.f32 %v2684_v17, %v4880_v47 }
 0x550   :  { %v2368_v20 = vpop.f32.mrb[26].mxu0 }
 0x551   :  { %v2686_v45 = vmax.f32 %v2685_v19, %v2368_v20  ;;  %v4250_v21 = vpop.f32.mrb[27].mxu0 }
 0x553   :  { %v2687_v23 = vmax.f32 %v2686_v45, %v4889_v50 }
 0x554   :  { %v2524_v24 = vpop.f32.mrb[28].mxu0 }
 0x555   :  { %v2688_v25 = vmax.f32 %v2687_v23, %v2524_v24  ;;  %v4260_v26 = vpop.f32.mrb[29].mxu0 }
 0x557   :  { %v2689_v27 = vmax.f32 %v2688_v25, %v2602_v53 }
 0x558   :  { %v2680_v57 = vpop.f32.mrb[30].mxu0 }
 0x559   :  { %v2690_v29 = vmax.f32 %v2689_v27, %v2680_v57  ;;  %v4270_v31 = vpop.f32.mrb[31].mxu0 }
 0x55b   :  { %v2691_v32 = vsub.f32 %v4871_v44, %v2690_v29  ;;  %v2694_v34 = vsub.f32 %v2212_v16, %v2690_v29  ;;  %v2697_v35 = vsub.f32 %v4880_v47, %v2690_v29  ;;  %v2700_v37 = vsub.f32 %v2368_v20, %v2690_v29 }
 0x55c   :  { %v2703_v38 = vsub.f32 %v4889_v50, %v2690_v29  ;;  %v2706_v40 = vsub.f32 %v2524_v24, %v2690_v29  ;;  %v2709_v41 = vsub.f32 %v2602_v53, %v2690_v29  ;;  %v2712_v42 = vsub.f32 %v2680_v57, %v2690_v29 }
 0x55d   :  { %v2692_v43 = vmul.f32 1.442695, %v2691_v32  ;;  %v2695_v46 = vmul.f32 1.442695, %v2694_v34  ;;  %v2698_v48 = vmul.f32 1.442695, %v2697_v35 }
 0x55e   :  { %v2701_v49 = vmul.f32 1.442695, %v2700_v37  ;;  %v2704_v51 = vmul.f32 1.442695, %v2703_v38  ;;  %v2707_v52 = vmul.f32 1.442695, %v2706_v40 }
 0x55f   :  { %4408 = vpow2.f32 %v2692_v43  ;;  %v2710_v44 = vmul.f32 1.442695, %v2709_v41  ;;  %v2713_v47 = vmul.f32 1.442695, %v2712_v42 }
 0x560   :  { %4410 = vpow2.f32 %v2695_v46 }
 0x561   :  { %4412 = vpow2.f32 %v2698_v48 }
 0x562   :  { %4414 = vpow2.f32 %v2701_v49 }
 0x563   :  { %4416 = vpow2.f32 %v2704_v51 }
 0x564   :  { %4418 = vpow2.f32 %v2707_v52 }
 0x565   :  { %4420 = vpow2.f32 %v2710_v44 }
 0x566   :  { %4422 = vpow2.f32 %v2713_v47 }
 0x569   :  { %v4409_v55 = vpop.eup %4408 }
 0x56a   :  { %v4411_v56 = vpop.eup %4410 }
 0x56b   :  { %v2715_v50 = vadd.f32 %v4411_v56, %v4409_v55  ;;  %v4413_v53 = vpop.eup %4412 }
 0x56c   :  { %v4415_v59 = vpop.eup %4414 }
 0x56d   :  { %v2716_v58 = vadd.f32 %v4413_v53, %v2715_v50  ;;  %v4417_v61 = vpop.eup %4416 }
 0x56e   :  { %v4419_v1 = vpop.eup %4418 }
 0x56f   :  { %v2717_v60 = vadd.f32 %v4415_v59, %v2716_v58  ;;  %v4421_v3 = vpop.eup %4420 }
 0x570   :  { %v4423_v5 = vpop.eup %4422 }
 0x571   :  { %v2718_v63 = vadd.f32 %v4417_v61, %v2717_v60 }
 0x573   :  { %v2719_v2 = vadd.f32 %v4419_v1, %v2718_v63 }
 0x575   :  { %v2720_v4 = vadd.f32 %v4421_v3, %v2719_v2 }
 0x577   :  { %v2721_v6 = vadd.f32 %v4423_v5, %v2720_v4 }
 0x579   :  { %v2722_v7 = vmul.f32 8.0, %v2721_v6 }
 0x57b   :  { %4424 = vrcp.f32 %v2722_v7 }
 0x585   :  { %v4425_v8 = vpop.eup %4424 }
 0x586   :  { %v2724_v9 = vmul.f32 %v4425_v8, %v4409_v55  ;;  %v2798_v10 = vmul.f32 %v4425_v8, %v4411_v56  ;;  %v3022_v12 = vmul.f32 %v4425_v8, %v4413_v53  ;;  %v3173_v13 = vmul.f32 %v4425_v8, %v4415_v59 }
 0x587   :  { %v3324_v14 = vmul.f32 %v4425_v8, %v4417_v61  ;;  %v3475_v15 = vmul.f32 %v4425_v8, %v4419_v1  ;;  %v3626_v16 = vmul.f32 %v4425_v8, %v4421_v3  ;;  %v3777_v17 = vmul.f32 %v4425_v8, %v4423_v5 }
 0x588   :  { %4274 = vmatmul.mubr.msk.f32.vlgmr.msra.gmra.mrb[36].mxu1 %vm188_vm2, %v2724_v9  ;;  %4279 = vmatmul.mubr.msk.f32.vlgmr.msra.gmra.mrb[32].mxu0 %vm188_vm2, %v2798_v10 }
 0x589   :  { %4282 = vmatpush3.msra.mxu1 %v4745_v54  ;;  %4283 = vmatprep.mubr.msk.f32.mxu1 %vm4528_vm1, %v4527_v0  ;;  %v3175_v54 = vpop.permute.xlu1 %3174 }
 0x58a   :  { %4287 = vmatpush3.msra.mxu0 %v4755_v62  ;;  %4288 = vmatprep.mubr.msk.f32.mxu0 %vm4528_vm1, %v4527_v0  ;;  %v3326_v62 = vpop.permute.xlu0 %3325 }
 0x58b   :  { %4291 = vmatprep.subr.mxu1 %v4527_v0  ;;  %4296 = vmatprep.subr.mxu0 %v4527_v0 }
 0x58e   :  { %v3628_v23 = vpop.permute.xlu0 %3627 }
 0x65b   :  { %v2794_v19 = vpop.f32.mrb[36].mxu1  ;;  %v2872_v20 = vpop.f32.mrb[32].mxu0 }
 0x65c   :  { %v4275_v45 = vpop.f32.mrb[37].mxu1  ;;  %v4280_v21 = vpop.f32.mrb[33].mxu0  ;;  %4284 = vmatmul.mubr.msk.f32.vlgmr.msra.gmra.mrb[38].mxu1 %vm188_vm2, %v2872_v20  ;;  %4289 = vmatmul.mubr.msk.f32.vlgmr.msra.gmra.mrb[34].mxu0 %vm188_vm2, %v2794_v19 }
 0x65d   :  { %4292 = vmatpush3.msra.mxu1 %v3024_v18  ;;  %4293 = vmatprep.mubr.msk.f32.mxu1 %vm4528_vm1, %v4527_v0 }
 0x65e   :  { %4301 = vmatprep.subr.mxu1 %v4527_v0  ;;  %4297 = vmatpush3.msra.mxu0 %v4824_v22  ;;  %v3477_v22 = vpop.permute.xlu1 %3476 }
 0x65f   :  { %4298 = vmatprep.mubr.msk.f32.mxu0 %vm4528_vm1, %v4527_v0  ;;  %4306 = vmatprep.subr.mxu0 %v4527_v0 }
 0x660   :  { %4294 = vmatmul.mubr.msk.f32.vlgmr.msra.gmra.mrb[40].mxu1 %vm188_vm2, %v3022_v12 }
 0x661   :  { %4302 = vmatpush3.msra.mxu1 %v3175_v54  ;;  %4303 = vmatprep.mubr.msk.f32.mxu1 %vm4528_vm1, %v4527_v0 }
 0x662   :  { %4311 = vmatprep.subr.mxu1 %v4527_v0  ;;  %v3779_v24 = vpop.permute.xlu1 %3778 }
 0x664   :  { %4304 = vmatmul.mubr.msk.f32.vlgmr.msra.gmra.mrb[42].mxu1 %vm188_vm2, %v3173_v13 }
 0x665   :  { %4312 = vmatpush3.msra.mxu1 %v3326_v62  ;;  %4313 = vmatprep.mubr.msk.f32.mxu1 %vm4528_vm1, %v4527_v0 }
 0x666   :  { %4321 = vmatprep.subr.mxu1 %v4527_v0 }
 0x668   :  { %4314 = vmatmul.mubr.msk.f32.vlgmr.msra.gmra.mrb[44].mxu1 %vm188_vm2, %v3324_v14 }
 0x669   :  { %4322 = vmatpush3.msra.mxu1 %v3477_v22  ;;  %4323 = vmatprep.mubr.msk.f32.mxu1 %vm4528_vm1, %v4527_v0 }
 0x66a   :  { %4331 = vmatprep.subr.mxu1 %v4527_v0 }
 0x66c   :  { %4324 = vmatmul.mubr.msk.f32.vlgmr.msra.gmra.mrb[46].mxu1 %vm188_vm2, %v3475_v15 }
 0x66d   :  { %4332 = vmatpush3.msra.mxu1 %v3628_v23  ;;  %4333 = vmatprep.mubr.msk.f32.mxu1 %vm4528_vm1, %v4527_v0 }
 0x66e   :  { %4341 = vmatprep.subr.mxu1 %v4527_v0 }
 0x670   :  { %4334 = vmatmul.mubr.msk.f32.vlgmr.msra.gmra.mrb[48].mxu1 %vm188_vm2, %v3626_v16 }
 0x671   :  { %4342 = vmatpush3.msra.mxu1 %v3779_v24  ;;  %4343 = vmatprep.mubr.msk.f32.mxu1 %vm4528_vm1, %v4527_v0 }
 0x674   :  { %4344 = vmatmul.mubr.msk.f32.vlgmr.msra.gmra.mrb[50].mxu1 %vm188_vm2, %v3777_v17 }
 0x72f   :  { %v2945_v25 = vpop.f32.mrb[38].mxu1  ;;  %v3018_v26 = vpop.f32.mrb[34].mxu0 }
 0x730   :  { %v3019_v27 = vadd.f32 %v3018_v26, %v2945_v25  ;;  %v4285_v57 = vpop.f32.mrb[39].mxu1  ;;  %v4290_v29 = vpop.f32.mrb[35].mxu0 }
 0x733   :  { %v3095_v31 = vpop.f32.mrb[40].mxu1 }
 0x734   :  { %v4295_v32 = vpop.f32.mrb[41].mxu1  ;;  %4299 = vmatmul.mubr.msk.f32.vlgmr.msra.gmra.mrb[36].mxu0 %vm188_vm2, %v3095_v31 }
 0x735   :  { %4307 = vmatpush3.msra.mxu0 %v4830_v28  ;;  %4308 = vmatprep.mubr.msk.f32.mxu0 %vm4528_vm1, %v4527_v0 }
 0x736   :  { %4316 = vmatprep.subr.mxu0 %v4527_v0 }
 0x737   :  { %v3246_v34 = vpop.f32.mrb[42].mxu1 }
 0x738   :  { %v4305_v35 = vpop.f32.mrb[43].mxu1  ;;  %4309 = vmatmul.mubr.msk.f32.vlgmr.msra.gmra.mrb[38].mxu0 %vm188_vm2, %v3246_v34 }
 0x739   :  { %4317 = vmatpush3.msra.mxu0 %v4837_v30  ;;  %4318 = vmatprep.mubr.msk.f32.mxu0 %vm4528_vm1, %v4527_v0 }
 0x73a   :  { %4326 = vmatprep.subr.mxu0 %v4527_v0 }
 0x73b   :  { %v3397_v37 = vpop.f32.mrb[44].mxu1 }
 0x73c   :  { %v4315_v38 = vpop.f32.mrb[45].mxu1  ;;  %4319 = vmatmul.mubr.msk.f32.vlgmr.msra.gmra.mrb[40].mxu0 %vm188_vm2, %v3397_v37 }
 0x73d   :  { %4327 = vmatpush3.msra.mxu0 %v4844_v33  ;;  %4328 = vmatprep.mubr.msk.f32.mxu0 %vm4528_vm1, %v4527_v0 }
 0x73e   :  { %4336 = vmatprep.subr.mxu0 %v4527_v0 }
 0x73f   :  { %v3548_v28 = vpop.f32.mrb[46].mxu1 }
 0x740   :  { %v4325_v40 = vpop.f32.mrb[47].mxu1  ;;  %4329 = vmatmul.mubr.msk.f32.vlgmr.msra.gmra.mrb[42].mxu0 %vm188_vm2, %v3548_v28 }
 0x741   :  { %4337 = vmatpush3.msra.mxu0 %v4851_v36  ;;  %4338 = vmatprep.mubr.msk.f32.mxu0 %vm4528_vm1, %v4527_v0 }
 0x742   :  { %4346 = vmatprep.subr.mxu0 %v4527_v0 }
 0x743   :  { %v3699_v30 = vpop.f32.mrb[48].mxu1 }
 0x744   :  { %v4335_v41 = vpop.f32.mrb[49].mxu1  ;;  %4339 = vmatmul.mubr.msk.f32.vlgmr.msra.gmra.mrb[44].mxu0 %vm188_vm2, %v3699_v30 }
 0x745   :  { %4347 = vmatpush3.msra.mxu0 %v4858_v39  ;;  %4348 = vmatprep.mubr.msk.f32.mxu0 %vm4528_vm1, %v4527_v0 }
 0x747   :  { %v3850_v33 = vpop.f32.mrb[50].mxu1 }
 0x748   :  { %v4345_v42 = vpop.f32.mrb[51].mxu1  ;;  %4349 = vmatmul.mubr.msk.f32.vlgmr.msra.gmra.mrb[46].mxu0 %vm188_vm2, %v3850_v33 }
 0x807   :  { %v3168_v43 = vpop.f32.mrb[36].mxu0 }
 0x808   :  { %v3172_v36 = vadd.f32 %v3168_v43, %v3019_v27  ;;  %v4300_v46 = vpop.f32.mrb[37].mxu0 }
 0x80b   :  { %v3319_v48 = vpop.f32.mrb[38].mxu0 }
 0x80c   :  { %v3323_v49 = vadd.f32 %v3319_v48, %v3172_v36  ;;  %v4310_v51 = vpop.f32.mrb[39].mxu0 }
 0x80f   :  { %v3470_v52 = vpop.f32.mrb[40].mxu0 }
 0x810   :  { %v3474_v44 = vadd.f32 %v3470_v52, %v3323_v49  ;;  %v4320_v47 = vpop.f32.mrb[41].mxu0 }
 0x813   :  { %v3621_v55 = vpop.f32.mrb[42].mxu0 }
 0x814   :  { %v3625_v56 = vadd.f32 %v3621_v55, %v3474_v44  ;;  %v4330_v50 = vpop.f32.mrb[43].mxu0 }
 0x817   :  { %v3772_v39 = vpop.f32.mrb[44].mxu0 }
 0x818   :  { %v3776_v53 = vadd.f32 %v3772_v39, %v3625_v56  ;;  %v4340_v58 = vpop.f32.mrb[45].mxu0 }
 0x81b   :  { %v3923_v0 = vpop.f32.mrb[46].mxu0 }
 0x81c   :  { %v3927_v59 = vadd.f32 %v3923_v0, %v3776_v53  ;;  %v4350_v60 = vpop.f32.mrb[47].mxu0 }
 0x81e   :  { %v3928_v61 = vadd.f32 %v4905_v11, %v3927_v59 }
 0x820   :  { %3929 = vst.msk [vmem:[#allocation8 + $0x8] sm:$0xff] %vm92_vm0, %v3928_v61 }
 0x821   :  { %4503 = shalt.err (!%p4500_p0)
}
 0x822   :  { %s4504_s26 = scalar_lea.hbm %s5001_s5, 256 }
 0x823   :  { %p4505_p1 = scmp.ne.s32.totalorder %s5001_s5, %s4504_s26  ;;  %p4508_p2 = scmp.lt.u32.totalorder %s4504_s26, %s5001_s5 }
 0x825   :  { %p4510_p3 = pnand %p4508_p2, %p4505_p1 }
 0x827   :  { %4513 = shalt.err (!%p4510_p3)
}
 0x828   :  { %3941 = dma.vmem_to_hbm [thread:$0]  %s3936_s22, 256, %s5001_s5, [#allocation4], %s4524_s1, %s4524_s1, %s4525_s17  }
 0x829   :  { %4518 = dma.done.wait [#allocation4], 256  }
 0x82a   :  { %4519 = vsyncadd [#allocation4], 4294967040 }
 0x82b   :  { %3945 = vsyncpa [#allocation3], 1 }
 0x82c   :  { %3946 = vsyncpa [#allocation6], 1 }
 0x82d   :  { %3947 = vsyncpa [#allocation4], 1 }

</bundles_post_ra>
